<compile_context>
chip_gen: v7x
topology: tpu7x:2x2x1
jax: 0.10.0
libtpu: 0.0.40
codegen_flags: <defaults>
</compile_context>

<pallas_src>
import jax
import jax.numpy as jnp
from jax.experimental import pallas as pl
from jax.experimental.pallas import tpu as pltpu


def _pick_tile(dim, max_tile=128, multiple=16):
    """Largest divisor of `dim` <= max_tile that is a multiple of `multiple`
    (falls back to the full dim, which is always a legal block)."""
    if dim <= max_tile:
        return dim
    t = (max_tile // multiple) * multiple
    while t >= multiple:
        if dim % t == 0:
            return t
        t -= multiple
    return dim


# ----------------------------------------------------------------------------
# Fused self-attention kernel (one grid step = one batch element x query tile)
# ----------------------------------------------------------------------------
def _self_attention_kernel(xq_ref, xkv_ref, xres_ref,
                           wq_ref, wk_ref, wv_ref,
                           bq_ref, bk_ref, bv_ref,
                           gamma_ref, o_ref):
    # xq_ref  : (TQ, C)  bf16 -- query pixels of this tile, channels-last
    # xkv_ref : (HW, C)  bf16 -- all pixels of this batch element (keys / values)
    # xres_ref: (TQ, C)  f32  -- residual x in torch's `.view`-reinterpreted layout
    xq = xq_ref[...]
    xkv = xkv_ref[...]

    # 1x1-conv projections == per-pixel matmuls: bf16 operands, f32 accumulation.
    q = jnp.dot(xq, wq_ref[...], preferred_element_type=jnp.float32) + bq_ref[...]    # (TQ, C8)
    k = jnp.dot(xkv, wk_ref[...], preferred_element_type=jnp.float32) + bk_ref[...]   # (HW, C8)
    v = jnp.dot(xkv, wv_ref[...], preferred_element_type=jnp.float32) + bv_ref[...]   # (HW, C)

    # energy[i, j] = <q_i, k_j>; contraction depth C//8 is tiny, keep it in f32 so
    # the softmax logits stay accurate (negligible MXU cost).
    energy = jax.lax.dot_general(
        q, k, (((1,), (1,)), ((), ())), preferred_element_type=jnp.float32)           # (TQ, HW)

    # Row softmax in f32 (exp -> EUP, reductions -> XLU, reciprocal -> EUP).
    m = jnp.max(energy, axis=-1, keepdims=True)
    p = jnp.exp(energy - m)
    s = jnp.sum(p, axis=-1, keepdims=True)
    attn = p * pl.reciprocal(s, approx=True)

    # out = attention @ value: bf16 operands on the MXU, f32 accumulation.
    out = jnp.dot(attn.astype(jnp.bfloat16), v.astype(jnp.bfloat16),
                  preferred_element_type=jnp.float32)                                  # (TQ, C)

    # gamma * out + x, with x presented in the same (reinterpreted) layout as out.
    o_ref[...] = gamma_ref[0] * out + xres_ref[...]


# ----------------------------------------------------------------------------
# Wrapper
# ----------------------------------------------------------------------------
def self_attention(params, x, *, max_query_tile=128):
    """Pallas implementation of SelfAttention.forward.  x: (B, C, H, W) float32."""
    B, C, H, W = x.shape
    HW = H * W
    C8 = C // 8
    assert C8 >= 1, "in_channels must be >= 8 (the torch module needs in_channels // 8 >= 1)"

    # Channels-last pixels for projections / attention (bf16 -> halves HBM traffic).
    x_t = jnp.transpose(x.reshape(B, C, HW), (0, 2, 1)).astype(jnp.bfloat16)   # (B, HW, C)
    # Residual presented in the layout torch's `.view(B, C, H, W)` imposes on the
    # (B, HW, C) bmm output: a plain row-major reinterpretation of NCHW x (f32).
    x_res = x.reshape(B, HW, C)

    wq = params["wq"].astype(jnp.bfloat16)                 # (C, C//8)
    wk = params["wk"].astype(jnp.bfloat16)                 # (C, C//8)
    wv = params["wv"].astype(jnp.bfloat16)                 # (C, C)
    bq = params["bq"].reshape(1, C8).astype(jnp.float32)
    bk = params["bk"].reshape(1, C8).astype(jnp.float32)
    bv = params["bv"].reshape(1, C).astype(jnp.float32)
    gamma = params["gamma"].reshape(1).astype(jnp.float32)

    tq = _pick_tile(HW, max_query_tile, 16)
    grid = (B, HW // tq)

    y_t = pl.pallas_call(
        _self_attention_kernel,
        out_shape=jax.ShapeDtypeStruct((B, HW, C), jnp.float32),
        grid=grid,
        in_specs=[
            pl.BlockSpec((None, tq, C), lambda b, i: (b, i, 0)),   # query rows (bf16)
            pl.BlockSpec((None, HW, C), lambda b, i: (b, 0, 0)),   # all rows for K/V (bf16)
            pl.BlockSpec((None, tq, C), lambda b, i: (b, i, 0)),   # residual (f32)
            pl.BlockSpec((C, C8), lambda b, i: (0, 0)),            # wq
            pl.BlockSpec((C, C8), lambda b, i: (0, 0)),            # wk
            pl.BlockSpec((C, C), lambda b, i: (0, 0)),             # wv
            pl.BlockSpec((1, C8), lambda b, i: (0, 0)),            # bq
            pl.BlockSpec((1, C8), lambda b, i: (0, 0)),            # bk
            pl.BlockSpec((1, C), lambda b, i: (0, 0)),             # bv
            pl.BlockSpec(memory_space=pltpu.MemorySpace.SMEM),     # gamma (scalar)
        ],
        out_specs=pl.BlockSpec((None, tq, C), lambda b, i: (b, i, 0)),
        compiler_params=pltpu.CompilerParams(
            dimension_semantics=("parallel", "parallel"),
        ),
    )(x_t, x_t, x_res, wq, wk, wv, bq, bk, bv, gamma)

    # torch's `out.view(B, C, H, W)` on the contiguous (B, HW, C) tensor is a pure
    # reinterpretation; this row-major reshape reproduces it exactly (free).
    return y_t.reshape(B, C, H, W)


# ----------------------------------------------------------------------------
# Pure-JAX reference (mirrors the torch code line by line) + params
# ----------------------------------------------------------------------------
def self_attention_reference(params, x):
    B, C, H, W = x.shape
    HW = H * W

    def conv1x1(w, b):  # w: (Cin, Cout), torch weight W[o, i] == w[i, o]
        return jnp.einsum("bihw,io->bohw", x, w) + b.reshape(1, -1, 1, 1)

    q = conv1x1(params["wq"], params["bq"])
    k = conv1x1(params["wk"], params["bk"])
    v = conv1x1(params["wv"], params["bv"])
    pq = q.reshape(B, -1, HW).transpose(0, 2, 1)        # (B, HW, C//8)
    pk = k.reshape(B, -1, HW)                           # (B, C//8, HW)
    energy = jnp.einsum("bqc,bck->bqk", pq, pk)
    attn = jax.nn.softmax(energy, axis=2)
    pv = v.reshape(B, -1, HW)                           # (B, C, HW)
    out = jnp.einsum("bqk,bck->bqc", attn, pv)          # (B, HW, C)
    out = out.reshape(B, C, H, W)                       # torch `.view` reinterpretation
    return params["gamma"][0] * out + x


def init_params(key, channels):
    c8 = channels // 8
    k1, k2, k3, k4, k5, k6 = jax.random.split(key, 6)
    scale = 1.0 / (channels ** 0.5)
    return {
        "wq": jax.random.normal(k1, (channels, c8), jnp.float32) * scale,
        "bq": jax.random.normal(k2, (c8,), jnp.float32) * scale,
        "wk": jax.random.normal(k3, (channels, c8), jnp.float32) * scale,
        "bk": jax.random.normal(k4, (c8,), jnp.float32) * scale,
        "wv": jax.random.normal(k5, (channels, channels), jnp.float32) * scale,
        "bv": jax.random.normal(k6, (channels,), jnp.float32) * scale,
        # torch initializes gamma to 0 (a learnable scalar); use a nonzero value so
        # the attention path actually contributes to the checked output.
        "gamma": jnp.array([0.5], jnp.float32),
    }


if __name__ == "__main__":
    key = jax.random.PRNGKey(0)
    pkey, xkey = jax.random.split(key)

    # channels must be >= 8 for this module (in_channels // 8 output channels)
    B, C, H, W = 2, 64, 16, 16
    params = init_params(pkey, C)
    x = jax.random.normal(xkey, (B, C, H, W), jnp.float32)

    fwd = jax.jit(self_attention)
    y = fwd(params, x)
    jax.block_until_ready(y)

    y_ref = self_attention_reference(params, x)
    assert y.shape == (B, C, H, W)
    assert bool(jnp.all(jnp.isfinite(y)))
    max_err = float(jnp.max(jnp.abs(y - y_ref)))
    assert bool(jnp.allclose(y, y_ref, atol=5e-2, rtol=5e-2)), f"max abs err {max_err}"
    print("KERNEL_OK")
</pallas_src>

<mosaic_0001>
module attributes {stable_mosaic.version = 11 : i64} {
  func.func @_self_attention_kernel(%arg0: i32, %arg1: i32, %arg2: memref<1x128x64xbf16, #tpu.memory_space<vmem>>, %arg3: memref<1x256x64xbf16, #tpu.memory_space<vmem>>, %arg4: memref<1x128x64xf32, #tpu.memory_space<vmem>>, %arg5: memref<64x8xbf16, #tpu.memory_space<vmem>>, %arg6: memref<64x8xbf16, #tpu.memory_space<vmem>>, %arg7: memref<64x64xbf16, #tpu.memory_space<vmem>>, %arg8: memref<1x8xf32, #tpu.memory_space<vmem>>, %arg9: memref<1x8xf32, #tpu.memory_space<vmem>>, %arg10: memref<1x64xf32, #tpu.memory_space<vmem>>, %arg11: memref<1xf32, #tpu.memory_space<smem>>, %arg12: memref<1x128x64xf32, #tpu.memory_space<vmem>>) attributes {dimension_semantics = [#tpu.dimension_semantics<parallel>, #tpu.dimension_semantics<parallel>], iteration_bounds = array<i64: 2, 2>, scalar_prefetch = 0 : i64, scratch_operands = 0 : i64, tpu.core_type = #tpu.core_type<tc>, window_params = [{transform_indices = @transform_0, window_bounds = array<i64: 1, 128, 64>}, {transform_indices = @transform_1, window_bounds = array<i64: 1, 256, 64>}, {transform_indices = @transform_2, window_bounds = array<i64: 1, 128, 64>}, {pipeline_mode = #tpu.pipeline_mode<synchronous>, transform_indices = @transform_3, window_bounds = array<i64: 64, 8>}, {pipeline_mode = #tpu.pipeline_mode<synchronous>, transform_indices = @transform_4, window_bounds = array<i64: 64, 8>}, {pipeline_mode = #tpu.pipeline_mode<synchronous>, transform_indices = @transform_5, window_bounds = array<i64: 64, 64>}, {pipeline_mode = #tpu.pipeline_mode<synchronous>, transform_indices = @transform_6, window_bounds = array<i64: 1, 8>}, {pipeline_mode = #tpu.pipeline_mode<synchronous>, transform_indices = @transform_7, window_bounds = array<i64: 1, 8>}, {pipeline_mode = #tpu.pipeline_mode<synchronous>, transform_indices = @transform_8, window_bounds = array<i64: 1, 64>}, {transform_indices = @transform_9, window_bounds = array<i64: 1>}, {transform_indices = @transform_10, window_bounds = array<i64: 1, 128, 64>}]} {
    %c0 = arith.constant 0 : index
    %c0_0 = arith.constant 0 : index
    %c0_1 = arith.constant 0 : index
    %0 = vector.load %arg2[%c0, %c0_0, %c0_1] : memref<1x128x64xbf16, #tpu.memory_space<vmem>>, vector<1x128x64xbf16>
    %1 = vector.shape_cast %0 : vector<1x128x64xbf16> to vector<128x64xbf16>
    %c0_2 = arith.constant 0 : index
    %c0_3 = arith.constant 0 : index
    %c0_4 = arith.constant 0 : index
    %2 = vector.load %arg3[%c0_2, %c0_3, %c0_4] : memref<1x256x64xbf16, #tpu.memory_space<vmem>>, vector<1x256x64xbf16>
    %3 = vector.shape_cast %2 : vector<1x256x64xbf16> to vector<256x64xbf16>
    %c0_5 = arith.constant 0 : index
    %c0_6 = arith.constant 0 : index
    %4 = vector.load %arg5[%c0_5, %c0_6] : memref<64x8xbf16, #tpu.memory_space<vmem>>, vector<64x8xbf16>
    %cst = arith.constant dense<0.000000e+00> : vector<128x8xf32>
    %5 = tpu.matmul %1, %4, %cst {dimension_numbers = #tpu.dot_dimension_numbers<[1], [0], [0], [1], [0, 0, 1, 1], [], []>} : vector<128x64xbf16>, vector<64x8xbf16>, vector<128x8xf32> -> vector<128x8xf32>
    %c0_7 = arith.constant 0 : index
    %c0_8 = arith.constant 0 : index
    %6 = vector.load %arg8[%c0_7, %c0_8] : memref<1x8xf32, #tpu.memory_space<vmem>>, vector<1x8xf32>
    %7 = vector.broadcast %6 : vector<1x8xf32> to vector<128x8xf32>
    %8 = arith.addf %5, %7 : vector<128x8xf32>
    %c0_9 = arith.constant 0 : index
    %c0_10 = arith.constant 0 : index
    %9 = vector.load %arg6[%c0_9, %c0_10] : memref<64x8xbf16, #tpu.memory_space<vmem>>, vector<64x8xbf16>
    %cst_11 = arith.constant dense<0.000000e+00> : vector<256x8xf32>
    %10 = tpu.matmul %3, %9, %cst_11 {dimension_numbers = #tpu.dot_dimension_numbers<[1], [0], [0], [1], [0, 0, 1, 1], [], []>} : vector<256x64xbf16>, vector<64x8xbf16>, vector<256x8xf32> -> vector<256x8xf32>
    %c0_12 = arith.constant 0 : index
    %c0_13 = arith.constant 0 : index
    %11 = vector.load %arg9[%c0_12, %c0_13] : memref<1x8xf32, #tpu.memory_space<vmem>>, vector<1x8xf32>
    %12 = vector.broadcast %11 : vector<1x8xf32> to vector<256x8xf32>
    %13 = arith.addf %10, %12 : vector<256x8xf32>
    %c0_14 = arith.constant 0 : index
    %c0_15 = arith.constant 0 : index
    %14 = vector.load %arg7[%c0_14, %c0_15] : memref<64x64xbf16, #tpu.memory_space<vmem>>, vector<64x64xbf16>
    %cst_16 = arith.constant dense<0.000000e+00> : vector<256x64xf32>
    %15 = tpu.matmul %3, %14, %cst_16 {dimension_numbers = #tpu.dot_dimension_numbers<[1], [0], [0], [1], [0, 0, 1, 1], [], []>} : vector<256x64xbf16>, vector<64x64xbf16>, vector<256x64xf32> -> vector<256x64xf32>
    %c0_17 = arith.constant 0 : index
    %c0_18 = arith.constant 0 : index
    %16 = vector.load %arg10[%c0_17, %c0_18] : memref<1x64xf32, #tpu.memory_space<vmem>>, vector<1x64xf32>
    %17 = vector.broadcast %16 : vector<1x64xf32> to vector<256x64xf32>
    %18 = arith.addf %15, %17 : vector<256x64xf32>
    %cst_19 = arith.constant dense<0.000000e+00> : vector<128x256xf32>
    %19 = tpu.matmul %8, %13, %cst_19 {dimension_numbers = #tpu.dot_dimension_numbers<[1], [1], [0], [0], [0, 0, 1, 0], [], []>} : vector<128x8xf32>, vector<256x8xf32>, vector<128x256xf32> -> vector<128x256xf32>
    %cst_20 = arith.constant dense<0xFF800000> : vector<128xf32>
    %20 = vector.multi_reduction <maximumf>, %19, %cst_20 [1] : vector<128x256xf32> to vector<128xf32>
    %21 = vector.shape_cast %20 : vector<128xf32> to vector<128x1xf32>
    %22 = vector.broadcast %21 : vector<128x1xf32> to vector<128x256xf32>
    %23 = arith.subf %19, %22 : vector<128x256xf32>
    %24 = math.exp %23 : vector<128x256xf32>
    %cst_21 = arith.constant dense<0.000000e+00> : vector<128xf32>
    %25 = vector.multi_reduction <add>, %24, %cst_21 [1] : vector<128x256xf32> to vector<128xf32>
    %26 = vector.shape_cast %25 : vector<128xf32> to vector<128x1xf32>
    %27 = tpu.reciprocal %26 {approx = true} : vector<128x1xf32> -> vector<128x1xf32>
    %28 = vector.broadcast %27 : vector<128x1xf32> to vector<128x256xf32>
    %29 = arith.mulf %24, %28 : vector<128x256xf32>
    %30 = arith.truncf %29 : vector<128x256xf32> to vector<128x256xbf16>
    %31 = arith.truncf %18 : vector<256x64xf32> to vector<256x64xbf16>
    %cst_22 = arith.constant dense<0.000000e+00> : vector<128x64xf32>
    %32 = tpu.matmul %30, %31, %cst_22 {dimension_numbers = #tpu.dot_dimension_numbers<[1], [0], [0], [1], [0, 0, 1, 1], [], []>} : vector<128x256xbf16>, vector<256x64xbf16>, vector<128x64xf32> -> vector<128x64xf32>
    %c0_23 = arith.constant 0 : index
    %33 = memref.load %arg11[%c0_23] : memref<1xf32, #tpu.memory_space<smem>>
    %34 = vector.broadcast %33 : f32 to vector<128x64xf32>
    %35 = arith.mulf %34, %32 : vector<128x64xf32>
    %c0_24 = arith.constant 0 : index
    %c0_25 = arith.constant 0 : index
    %c0_26 = arith.constant 0 : index
    %36 = vector.load %arg4[%c0_24, %c0_25, %c0_26] : memref<1x128x64xf32, #tpu.memory_space<vmem>>, vector<1x128x64xf32>
    %37 = vector.shape_cast %36 : vector<1x128x64xf32> to vector<128x64xf32>
    %38 = arith.addf %35, %37 : vector<128x64xf32>
    %c0_27 = arith.constant 0 : index
    %c0_28 = arith.constant 0 : index
    %c0_29 = arith.constant 0 : index
    %39 = vector.load %arg12[%c0_27, %c0_28, %c0_29] : memref<1x128x64xf32, #tpu.memory_space<vmem>>, vector<1x128x64xf32>
    %40 = vector.shape_cast %39 : vector<1x128x64xf32> to vector<128x64xf32>
    %41 = vector.shape_cast %38 : vector<128x64xf32> to vector<1x128x64xf32>
    tpu.vector_store %arg12[%c0_27, %c0_28, %c0_29], %41 {strides = array<i32>} : memref<1x128x64xf32, #tpu.memory_space<vmem>>, vector<1x128x64xf32>,
    return
  }
  func.func @transform_0(%arg0: i32, %arg1: i32) -> (i32, i32, i32) {
    %c0_i32 = arith.constant 0 : i32
    %c0_i32_0 = arith.constant 0 : i32
    return %arg0, %arg1, %c0_i32 : i32, i32, i32
  }
  func.func @transform_1(%arg0: i32, %arg1: i32) -> (i32, i32, i32) {
    %c0_i32 = arith.constant 0 : i32
    %c0_i32_0 = arith.constant 0 : i32
    %c0_i32_1 = arith.constant 0 : i32
    return %arg0, %c0_i32, %c0_i32_0 : i32, i32, i32
  }
  func.func @transform_2(%arg0: i32, %arg1: i32) -> (i32, i32, i32) {
    %c0_i32 = arith.constant 0 : i32
    %c0_i32_0 = arith.constant 0 : i32
    return %arg0, %arg1, %c0_i32 : i32, i32, i32
  }
  func.func @transform_3(%arg0: i32, %arg1: i32) -> (i32, i32) {
    %c0_i32 = arith.constant 0 : i32
    %c0_i32_0 = arith.constant 0 : i32
    %c0_i32_1 = arith.constant 0 : i32
    return %c0_i32, %c0_i32_0 : i32, i32
  }
  func.func @transform_4(%arg0: i32, %arg1: i32) -> (i32, i32) {
    %c0_i32 = arith.constant 0 : i32
    %c0_i32_0 = arith.constant 0 : i32
    %c0_i32_1 = arith.constant 0 : i32
    return %c0_i32, %c0_i32_0 : i32, i32
  }
  func.func @transform_5(%arg0: i32, %arg1: i32) -> (i32, i32) {
    %c0_i32 = arith.constant 0 : i32
    %c0_i32_0 = arith.constant 0 : i32
    %c0_i32_1 = arith.constant 0 : i32
    return %c0_i32, %c0_i32_0 : i32, i32
  }
  func.func @transform_6(%arg0: i32, %arg1: i32) -> (i32, i32) {
    %c0_i32 = arith.constant 0 : i32
    %c0_i32_0 = arith.constant 0 : i32
    %c0_i32_1 = arith.constant 0 : i32
    return %c0_i32, %c0_i32_0 : i32, i32
  }
  func.func @transform_7(%arg0: i32, %arg1: i32) -> (i32, i32) {
    %c0_i32 = arith.constant 0 : i32
    %c0_i32_0 = arith.constant 0 : i32
    %c0_i32_1 = arith.constant 0 : i32
    return %c0_i32, %c0_i32_0 : i32, i32
  }
  func.func @transform_8(%arg0: i32, %arg1: i32) -> (i32, i32) {
    %c0_i32 = arith.constant 0 : i32
    %c0_i32_0 = arith.constant 0 : i32
    %c0_i32_1 = arith.constant 0 : i32
    return %c0_i32, %c0_i32_0 : i32, i32
  }
  func.func @transform_9(%arg0: i32, %arg1: i32) -> i32 {
    %c0_i32 = arith.constant 0 : i32
    %c0_i32_0 = arith.constant 0 : i32
    return %c0_i32 : i32
  }
  func.func @transform_10(%arg0: i32, %arg1: i32) -> (i32, i32, i32) {
    %c0_i32 = arith.constant 0 : i32
    %c0_i32_0 = arith.constant 0 : i32
    return %arg0, %arg1, %c0_i32 : i32, i32, i32
  }
}

</mosaic_0001>

<bundles_post_ra>
// kernel: self_attention.1
= control target key start
LH: loop header
LB: loop body
LE: loop exit
PB: predicated region body
PF: predicated region fallthrough
CT: control target
= control target key end

     0   :  { %s2851_s15 = smov 0   ;;  %s2853_s16 = smov 0   ;;  %s3709_s0 = inlined_call_operand.vmem [shape: bf16[2,256,64], index: 0, kind: input, shape index: {}, may-alias: {0,1}]   ;;  %s3710_s1 = inlined_call_operand.vmem [shape: bf16[2,256,64], index: 1, kind: input, shape index: {}, may-alias: {0,1}]   ;;  %s3711_s2 = inlined_call_operand.vmem [shape: f32[2,256,64], index: 2, kind: input, shape index: {}]   ;;  %s3712_s3 = inlined_call_operand.vmem [shape: bf16[64,8], index: 3, kind: input, shape index: {}]   ;;  %s3713_s4 = inlined_call_operand.vmem [shape: bf16[64,8], index: 4, kind: input, shape index: {}]   ;;  %s3714_s5 = inlined_call_operand.vmem [shape: bf16[64,64], index: 5, kind: input, shape index: {}]   ;;  %s3715_s6 = inlined_call_operand.vmem [shape: f32[1,8], index: 6, kind: input, shape index: {}]   ;;  %s3716_s7 = inlined_call_operand.vmem [shape: f32[1,8], index: 7, kind: input, shape index: {}]   ;;  %s3717_s8 = inlined_call_operand.vmem [shape: f32[1,64], index: 8, kind: input, shape index: {}]   ;;  %s3718_s9 = inlined_call_operand.<no memory space> [shape: f32[1], index: 9, kind: input, shape index: {}]   ;;  %s3719_s10 = inlined_call_operand.vmem [shape: f32[2,256,64], index: 10, kind: output, shape index: {}]  }
   0x1   :  { %15 = sst [smem:[#allocation2]] %s3718_s9  ;;  %s2855_s17 = smov 0  }
   0x2   :  { %s2857_s18 = smov 0   ;;  %s2859_s19 = smov 0  }
   0x3 LB: > { %s30_s9 = sadd.s32 1, %s2783_s17  ;;  %s33_s20 = sadd.s32 1, %s2787_s18  ;;  %s2791_s19 = sphi %s2859_s19, %s21_s19   ;;  %s2787_s18 = sphi %s2857_s18, %s3729_s18   ;;  %s2783_s17 = sphi %s2855_s17, %s3728_s17   ;;  %s2779_s16 = sphi %s2853_s16, %s3727_s16   ;;  %s2775_s15 = sphi %s2851_s15, %s3726_s15  }
   0x4   : > { %p31_p0 = scmp.ge.s32.totalorder %s30_s9, 2  ;;  %p2099_p1 = scmp.ge.s32.totalorder %s2791_s19, 1 }
   0x5   : > { %p361_p2 = scmp.lt.s32.totalorder %s2791_s19, 5 }
   0x6   : > { %s3731_s9 = smov (%p31_p0, %s30_s9), 0  ;;  %s3733_s20 = smov (!%p31_p0, %s33_s20), %s2787_s18 }
   0x7   : > { %p362_p3 = pnand %p2099_p1, %p361_p2  ;;  %p35_p4 = scmp.ge.s32.totalorder %s3733_s20, 2 }
   0x8   : > { %v2621_v0 = vld [vmem:[%s3712_s3] sm:$0xff] (!%p362_p3)   ;;  %s2100_s23 = sshll.u32 (!%p362_p3), %s2775_s15, 4  ;;  %v2622_v1 = vld [vmem:[%s3712_s3 + $0x8] sm:$0xff] (!%p362_p3)   ;;  %p422_p5 = scmp.lt.s32.totalorder (!%p362_p3), %s2779_s16, 1  ;;  %v2623_v2 = vld [vmem:[%s3712_s3 + $0x10] sm:$0xff] (!%p362_p3)   ;;  %vm584_vm0 = vcmask (!%p362_p3), 523264  }
   0x9   : > { %s3735_s20 = smov (%p35_p4, %s3733_s20), 0  ;;  %365 = sbr.rel (%p362_p3) target bundleno = 1172 (0x494), region = 60 }
   0xa   : > { %2573 = vmatprep.subr.bf16.mxu1 (!%p362_p3), %v2621_v0  ;;  %p424_p6 = scmp.lt.s32.totalorder (!%p362_p3), %s2100_s23, 31  ;;  %2421 = vmatprep.subr.bf16.mxu0 (!%p362_p3), %v2621_v0  ;;  %v2624_v3 = vld [vmem:[%s3712_s3 + $0x18] sm:$0xff] (!%p362_p3)   ;;  %v2627_v5 = vld [vmem:[%s3713_s4] sm:$0xff] (!%p362_p3)   ;;  %v2628_v8 = vld [vmem:[%s3713_s4 + $0x8] sm:$0xff] (!%p362_p3)   ;;  %vm1234_vm1 = vcmask (!%p362_p3), 64512   ;;  %s1909_s12 = sld [smem:[#allocation2]] (!%p362_p3) }
   0xb   : > { %2577 = vmatpush3.bf16.msra.mxu1 (!%p362_p3), %v2621_v0  ;;  %2422 = vmatpush3.bf16.msra.mxu0 (!%p362_p3), %v2621_v0  ;;  %v2631_v9 = vld [vmem:[%s3713_s4 + $0x10] sm:$0xff] (!%p362_p3)   ;;  %v2632_v12 = vld [vmem:[%s3713_s4 + $0x18] sm:$0xff] (!%p362_p3)   ;;  %v2111_v32 = vld [vmem:[%s3715_s6] ss:$0 sm:$0xff] (!%p362_p3) }
   0xc   : > { %2574 = vmatprep.subr.bf16.mxu1 (!%p362_p3), %v2622_v1  ;;  %2423 = vmatprep.subr.bf16.mxu0 (!%p362_p3), %v2622_v1  ;;  %v3036_v53 = vld [vmem:[%s3716_s7] ss:$0 sm:$0xff] (!%p362_p3)  ;;  %vm3124_vm2 = vmpackc.low (!%p362_p3), %vm1234_vm1, %vm1234_vm1 }
   0xf   : > { %2578 = vmatpush3.bf16.msra.mxu1 (!%p362_p3), %v2622_v1  ;;  %2424 = vmatpush3.bf16.msra.mxu0 (!%p362_p3), %v2622_v1 }
  0x10   : > { %s3737_s16 = smov (!%p422_p5, %s2779_s16), 1  ;;  %s3739_s23 = smov (!%p424_p6, %s2100_s23), 31  ;;  %2575 = vmatprep.subr.bf16.mxu1 %v2623_v2  ;;  %2425 = vmatprep.subr.bf16.mxu0 %v2623_v2 }
  0x11   : > { %s2101_s28 = sshll.u32 %s3737_s16, 5  ;;  %s2240_s29 = sshll.u32 %s3737_s16, 7 }
  0x12   : > { %s2890_s30 = sadd.s32 %s2101_s28, %s3739_s23  ;;  %s2899_s21 = scalar_lea.vmem %s3710_s1, %s2240_s29 }
  0x13   : > { %s2102_s13 = sshll.u32 %s2890_s30, 2  ;;  %2579 = vmatpush3.bf16.msra.mxu1 %v2623_v2  ;;  %2426 = vmatpush3.bf16.msra.mxu0 %v2623_v2  ;;  %v2633_v11 = vld [vmem:[%s2899_s21] sm:$0xff]   ;;  %v2929_v13 = vld [vmem:[%s2899_s21 + $0x8] sm:$0xff]   ;;  %v2932_v14 = vld [vmem:[%s2899_s21 + $0x10] sm:$0xff]  }
  0x14   : > { %s2904_s16 = scalar_lea.vmem %s3709_s0, %s2102_s13  ;;  %2576 = vmatprep.subr.bf16.mxu1 %v2624_v3  ;;  %2427 = vmatprep.subr.bf16.mxu0 %v2624_v3  ;;  %v2946_v19 = vld [vmem:[%s2899_s21 + $0x18] sm:$0xff]   ;;  %v2949_v20 = vld [vmem:[%s2899_s21 + $0x20] sm:$0xff]   ;;  %v2958_v21 = vld [vmem:[%s2899_s21 + $0x28] sm:$0xff]   ;;  %s2107_s13 = sshll.u32 %s2890_s30, 3 }
  0x15   : > { %v2625_v4 = vld [vmem:[%s2904_s16 + $0x20] sm:$0xff]   ;;  %v2626_v6 = vld [vmem:[%s2904_s16 + $0x28] sm:$0xff]   ;;  %v2629_v7 = vld [vmem:[%s2904_s16 + $0x30] sm:$0xff]   ;;  %s3630_s24 = scalar_lea.vmem %s3719_s10, %s2107_s13 }
  0x16   : > { %2437 = vmatprep.mubr.msk.bf16.mxu1 %vm584_vm0, %v2625_v4  ;;  %v2630_v10 = vld [vmem:[%s2904_s16 + $0x38] sm:$0xff]   ;;  %v2649_v15 = vld [vmem:[%s2904_s16] sm:$0xff]   ;;  %v2650_v16 = vld [vmem:[%s2904_s16 + $0x8] sm:$0xff]  }
  0x17   : > { %2580 = vmatpush3.bf16.msra.mxu1 %v2624_v3  ;;  %2428 = vmatpush3.bf16.msra.mxu0 %v2624_v3  ;;  %v2651_v17 = vld [vmem:[%s2904_s16 + $0x10] sm:$0xff]   ;;  %v2652_v18 = vld [vmem:[%s2904_s16 + $0x18] sm:$0xff]   ;;  %v2971_v24 = vld [vmem:[%s2899_s21 + $0x40] sm:$0xff]  }
  0x18   : > { %2445 = vmatprep.subr.bf16.mxu1 %v2627_v5  ;;  %2429 = vmatprep.mubr.msk.bf16.mxu0 %vm584_vm0, %v2649_v15  ;;  %v2961_v22 = vld [vmem:[%s2899_s21 + $0x30] sm:$0xff]   ;;  %v2968_v23 = vld [vmem:[%s2899_s21 + $0x38] sm:$0xff]   ;;  %v2978_v25 = vld [vmem:[%s2899_s21 + $0x48] sm:$0xff]  }
  0x19   : > { %v2981_v26 = vld [vmem:[%s2899_s21 + $0x50] sm:$0xff]   ;;  %v2988_v27 = vld [vmem:[%s2899_s21 + $0x58] sm:$0xff]   ;;  %v2991_v28 = vld [vmem:[%s2899_s21 + $0x60] sm:$0xff]  }
  0x1a   : > { %2438 = vmatmul.mubr.msk.bf16.vlgmr.msra.gmra.mrb[0].mxu1 %vm584_vm0, %v2626_v6  ;;  %2430 = vmatmul.mubr.msk.bf16.vlgmr.msra.gmra.mrb[0].mxu0 %vm584_vm0, %v2650_v16  ;;  %v2998_v29 = vld [vmem:[%s2899_s21 + $0x68] sm:$0xff]   ;;  %v3001_v30 = vld [vmem:[%s2899_s21 + $0x70] sm:$0xff]   ;;  %v3008_v31 = vld [vmem:[%s2899_s21 + $0x78] sm:$0xff]   ;;  %s3621_s21 = scalar_lea.vmem %s3711_s2, %s2107_s13 }
  0x1b   : > { %2446 = vmatpush3.bf16.msra.mxu1 %v2627_v5  ;;  %2441 = vmatprep.mubr.msk.bf16.mxu1 %vm584_vm0, %v2629_v7 }
  0x1c   : > { %2447 = vmatprep.subr.bf16.mxu1 %v2628_v8  ;;  %2433 = vmatprep.mubr.msk.bf16.mxu0 %vm584_vm0, %v2651_v17 }
  0x1f   : > { %2448 = vmatpush3.bf16.msra.mxu1 %v2628_v8 }
  0x20   : > { %2449 = vmatprep.subr.bf16.mxu1 %v2631_v9 }
  0x22   : > { %2442 = vmatmul.mubr.msk.bf16.gmra.mrb[4].mxu1 %vm584_vm0, %v2630_v10  ;;  %2434 = vmatmul.mubr.msk.bf16.gmra.mrb[4].mxu0 %vm584_vm0, %v2652_v18 }
  0x23   : > { %2450 = vmatpush3.bf16.msra.mxu1 %v2631_v9  ;;  %2453 = vmatprep.mubr.msk.bf16.mxu1 %vm584_vm0, %v2633_v11 }
  0x24   : > { %2451 = vmatprep.subr.bf16.mxu1 %v2632_v12  ;;  %2493 = vmatprep.mubr.msk.bf16.mxu0 %vm584_vm0, %v2633_v11 }
  0x27   : > { %2452 = vmatpush3.bf16.msra.mxu1 %v2632_v12 }
  0x2a   : > { %2454 = vmatmul.mubr.msk.bf16.vlgmr.msra.gmra.mrb[8].mxu1 %vm584_vm0, %v2929_v13 }
  0x2b   : > { %2457 = vmatprep.mubr.msk.bf16.mxu1 %vm584_vm0, %v2932_v14 }
  0x32   : > { %2458 = vmatmul.mubr.msk.bf16.gmra.mrb[12].mxu1 %vm584_vm0, %v2946_v19 }
  0x33   : > { %2461 = vmatprep.mubr.msk.bf16.mxu1 %vm584_vm0, %v2949_v20 }
  0x3a   : > { %2462 = vmatmul.mubr.msk.bf16.gmra.mrb[16].mxu1 %vm584_vm0, %v2958_v21 }
  0x3b   : > { %2465 = vmatprep.mubr.msk.bf16.mxu1 %vm584_vm0, %v2961_v22 }
  0x42   : > { %2466 = vmatmul.mubr.msk.bf16.gmra.mrb[20].mxu1 %vm584_vm0, %v2968_v23 }
  0x43   : > { %2469 = vmatprep.mubr.msk.bf16.mxu1 %vm584_vm0, %v2971_v24 }
  0x4a   : > { %2470 = vmatmul.mubr.msk.bf16.gmra.mrb[24].mxu1 %vm584_vm0, %v2978_v25 }
  0x4b   : > { %2473 = vmatprep.mubr.msk.bf16.mxu1 %vm584_vm0, %v2981_v26 }
  0x52   : > { %2474 = vmatmul.mubr.msk.bf16.gmra.mrb[28].mxu1 %vm584_vm0, %v2988_v27 }
  0x53   : > { %2477 = vmatprep.mubr.msk.bf16.mxu1 %vm584_vm0, %v2991_v28 }
  0x5a   : > { %2478 = vmatmul.mubr.msk.bf16.gmra.mrb[32].mxu1 %vm584_vm0, %v2998_v29 }
  0x5b   : > { %2481 = vmatprep.mubr.msk.bf16.mxu1 %vm584_vm0, %v3001_v30 }
  0x62   : > { %2482 = vmatmul.mubr.msk.bf16.gmra.mrb[36].mxu1 %vm584_vm0, %v3008_v31 }
  0xed   : > { %v2439_v33 = vpop.f32.mrb[0].mxu1  ;;  %v2431_v49 = vpop.f32.mrb[0].mxu0 }
  0xee   : > { %v3015_v34 = vadd.f32 %v2439_v33, %v2111_v32  ;;  %v675_v35 = vpop.f32.mrb[1].mxu1  ;;  %v3031_v50 = vadd.f32 %v2431_v49, %v2111_v32  ;;  %v643_v51 = vpop.f32.mrb[1].mxu0 }
  0xef   : > { %v3017_v36 = vadd.f32 %v2111_v32, %v675_v35  ;;  %v2440_v37 = vpop.f32.mrb[2].mxu1  ;;  %v3038_v54 = vadd.f32 %v2111_v32, %v643_v51  ;;  %v2432_v55 = vpop.f32.mrb[2].mxu0 }
  0xf0   : > { %v3019_v38 = vadd.f32 %v2440_v37, %v2111_v32  ;;  %v678_v39 = vpop.f32.mrb[3].mxu1  ;;  %v3040_v57 = vadd.f32 %v2432_v55, %v2111_v32  ;;  %v646_v58 = vpop.f32.mrb[3].mxu0 }
  0xf1   : > { %v3021_v40 = vadd.f32 %v2111_v32, %v678_v39  ;;  %v3042_v60 = vadd.f32 %v2111_v32, %v646_v58  ;;  %2325 = vmatprep.mubr.msk.f32.mxu1 %vm1234_vm1, %v3038_v54 }
  0xf5   : > { %v2443_v41 = vpop.f32.mrb[4].mxu1  ;;  %v2435_v4 = vpop.f32.mrb[4].mxu0 }
  0xf6   : > { %v3023_v42 = vadd.f32 %v2443_v41, %v2111_v32  ;;  %v691_v43 = vpop.f32.mrb[5].mxu1  ;;  %v3056_v5 = vadd.f32 %v2435_v4, %v2111_v32  ;;  %v659_v6 = vpop.f32.mrb[5].mxu0 }
  0xf7   : > { %v3025_v44 = vadd.f32 %v2111_v32, %v691_v43  ;;  %v2444_v45 = vpop.f32.mrb[6].mxu1  ;;  %v3058_v8 = vadd.f32 %v2111_v32, %v659_v6  ;;  %v2436_v9 = vpop.f32.mrb[6].mxu0 }
  0xf8   : > { %v3027_v46 = vadd.f32 %v2444_v45, %v2111_v32  ;;  %v694_v47 = vpop.f32.mrb[7].mxu1  ;;  %v3060_v11 = vadd.f32 %v2436_v9, %v2111_v32  ;;  %v662_v12 = vpop.f32.mrb[7].mxu0 }
  0xf9   : > { %v3029_v48 = vadd.f32 %v2111_v32, %v694_v47  ;;  %v3062_v16 = vadd.f32 %v2111_v32, %v662_v12 }
  0xfd   : > { %v2455_v52 = vpop.f32.mrb[8].mxu1 }
  0xfe   : > { %v907_v56 = vpop.f32.mrb[9].mxu1  ;;  %v3047_v61 = vadd.f32 %v2455_v52, %v3036_v53 }
  0xff   : > { %v2456_v59 = vpop.f32.mrb[10].mxu1  ;;  %v908_v0 = vadd.f32 %v3036_v53, %v907_v56 }
 0x100   : > { %v3050_v62 = vadd.f32 %v2456_v59, %v3036_v53  ;;  %v910_v63 = vpop.f32.mrb[11].mxu1 }
 0x101   : > { %v911_v1 = vadd.f32 %v3036_v53, %v910_v63 }
 0x102   : > { %v2534_v2 = vpack.c.bf16 %v3050_v62, %v3047_v61 }
 0x103   : > { %v2528_v3 = vpack.c.bf16 %v911_v1, %v908_v0 }
 0x105   : > { %v2459_v7 = vpop.f32.mrb[12].mxu1 }
 0x106   : > { %v923_v10 = vpop.f32.mrb[13].mxu1  ;;  %v3065_v17 = vadd.f32 %v2459_v7, %v3036_v53 }
 0x107   : > { %v2460_v15 = vpop.f32.mrb[14].mxu1  ;;  %v3071_v35 = vadd.f32 %v3036_v53, %v923_v10 }
 0x108   : > { %v3068_v18 = vadd.f32 %v2460_v15, %v3036_v53  ;;  %v926_v33 = vpop.f32.mrb[15].mxu1 }
 0x109   : > { %v3074_v37 = vadd.f32 %v3036_v53, %v926_v33 }
 0x10a   : > { %v2546_v39 = vpack.c.bf16 %v3068_v18, %v3065_v17 }
 0x10b   : > { %v2540_v32 = vpack.c.bf16 %v3074_v37, %v3071_v35 }
 0x10d   : > { %v2463_v41 = vpop.f32.mrb[16].mxu1 }
 0x10e   : > { %v939_v43 = vpop.f32.mrb[17].mxu1  ;;  %v3081_v47 = vadd.f32 %v2463_v41, %v3036_v53 }
 0x10f   : > { %v2464_v45 = vpop.f32.mrb[18].mxu1  ;;  %v3087_v52 = vadd.f32 %v3036_v53, %v939_v43 }
 0x110   : > { %v3084_v49 = vadd.f32 %v2464_v45, %v3036_v53  ;;  %v942_v51 = vpop.f32.mrb[19].mxu1 }
 0x111   : > { %v3090_v55 = vadd.f32 %v3036_v53, %v942_v51 }
 0x115   : > { %v2467_v59 = vpop.f32.mrb[20].mxu1 }
 0x116   : > { %v955_v63 = vpop.f32.mrb[21].mxu1  ;;  %v3097_v1 = vadd.f32 %v2467_v59, %v3036_v53 }
 0x117   : > { %v2468_v0 = vpop.f32.mrb[22].mxu1  ;;  %v3103_v7 = vadd.f32 %v3036_v53, %v955_v63 }
 0x118   : > { %v3100_v4 = vadd.f32 %v2468_v0, %v3036_v53  ;;  %v958_v6 = vpop.f32.mrb[23].mxu1  ;;  %v2653_v0 = vld [vmem:[%s3714_s5] sm:$0xff]  }
 0x119   : > { %v3106_v9 = vadd.f32 %v3036_v53, %v958_v6  ;;  %v2654_v6 = vld [vmem:[%s3714_s5 + $0x8] sm:$0xff]   ;;  %2485 = vmatprep.subr.bf16.mxu0 %v2653_v0 }
 0x11a   : > { %2486 = vmatpush3.bf16.msra.mxu0 %v2653_v0 }
 0x11b   : > { %2487 = vmatprep.subr.bf16.mxu0 %v2654_v6 }
 0x11d   : > { %v2471_v15 = vpop.f32.mrb[24].mxu1 }
 0x11e   : > { %v971_v33 = vpop.f32.mrb[25].mxu1  ;;  %v980_v43 = vadd.f32 %v2471_v15, %v3036_v53  ;;  %2488 = vmatpush3.bf16.msra.mxu0 %v2654_v6 }
 0x11f   : > { %v2472_v41 = vpop.f32.mrb[26].mxu1  ;;  %v972_v59 = vadd.f32 %v3036_v53, %v971_v33 }
 0x120   : > { %v983_v45 = vadd.f32 %v2472_v41, %v3036_v53  ;;  %v974_v51 = vpop.f32.mrb[27].mxu1 }
 0x121   : > { %v975_v63 = vadd.f32 %v3036_v53, %v974_v51  ;;  %v2655_v51 = vld [vmem:[%s3714_s5 + $0x10] sm:$0xff]  }
 0x122   : > { %v2531_v10 = vpack.c.bf16 %v983_v45, %v980_v43  ;;  %2489 = vmatprep.subr.bf16.mxu0 %v2655_v51 }
 0x123   : > { %v2525_v41 = vpack.c.bf16 %v975_v63, %v972_v59  ;;  %2490 = vmatpush3.bf16.msra.mxu0 %v2655_v51 }
 0x125   : > { %2527 = vmatprep.subr.msk.bf16.mxu1 %vm3124_vm2, %v2525_v41  ;;  %v2475_v33 = vpop.f32.mrb[28].mxu1 }
 0x126   : > { %2530 = vmatpush3.bf16.xpose.msk.msra.mxu1 %vm3124_vm2, %v2528_v3  ;;  %v996_v43 = vadd.f32 %v2475_v33, %v3036_v53  ;;  %v987_v45 = vpop.f32.mrb[29].mxu1  ;;  %v2656_v3 = vld [vmem:[%s3714_s5 + $0x18] sm:$0xff]  }
 0x127   : > { %2533 = vmatprep.subr.msk.bf16.mxu1 %vm3124_vm2, %v2531_v10  ;;  %v988_v59 = vadd.f32 %v3036_v53, %v987_v45  ;;  %v2476_v63 = vpop.f32.mrb[30].mxu1  ;;  %2491 = vmatprep.subr.bf16.mxu0 %v2656_v3 }
 0x128   : > { %v999_v0 = vadd.f32 %v2476_v63, %v3036_v53  ;;  %v990_v41 = vpop.f32.mrb[31].mxu1  ;;  %2492 = vmatpush3.bf16.msra.mxu0 %v2656_v3 }
 0x129   : > { %v991_v12 = vadd.f32 %v3036_v53, %v990_v41 }
 0x12a   : > { %v2543_v56 = vpack.c.bf16 %v999_v0, %v996_v43 }
 0x12b   : > { %v2537_v33 = vpack.c.bf16 %v991_v12, %v988_v59  ;;  %2494 = vmatmul.mubr.msk.bf16.vlgmr.msra.gmra.mrb[8].mxu0 %vm584_vm0, %v2929_v13 }
 0x12c   : > { %2497 = vmatprep.mubr.msk.bf16.mxu0 %vm584_vm0, %v2932_v14 }
 0x12d   : > { %v2479_v58 = vpop.f32.mrb[32].mxu1 }
 0x12e   : > { %2536 = vmatpush3.bf16.xpose.msk.msra.mxu1 %vm3124_vm2, %v2534_v2  ;;  %v1012_v10 = vadd.f32 %v2479_v58, %v3036_v53  ;;  %v1003_v6 = vpop.f32.mrb[33].mxu1 }
 0x12f   : > { %2539 = vmatprep.subr.msk.bf16.mxu1 %vm3124_vm2, %v2537_v33  ;;  %v1004_v45 = vadd.f32 %v3036_v53, %v1003_v6  ;;  %v2480_v63 = vpop.f32.mrb[34].mxu1 }
 0x130   : > { %v1015_v12 = vadd.f32 %v2480_v63, %v3036_v53  ;;  %v1006_v51 = vpop.f32.mrb[35].mxu1 }
 0x131   : > { %v1007_v43 = vadd.f32 %v3036_v53, %v1006_v51 }
 0x132   : > { %v2555_v59 = vpack.c.bf16 %v1015_v12, %v1012_v10 }
 0x133   : > { %v2549_v61 = vpack.c.bf16 %v1007_v43, %v1004_v45  ;;  %2498 = vmatmul.mubr.msk.bf16.gmra.mrb[12].mxu0 %vm584_vm0, %v2946_v19  ;;  %v3722_v19 = vpack.c.bf16 %v3090_v55, %v3087_v52 }
 0x134   : > { %2501 = vmatprep.mubr.msk.bf16.mxu0 %vm584_vm0, %v2949_v20  ;;  %v3723_v20 = vpack.c.bf16 %v3084_v49, %v3081_v47 }
 0x135   : > { %v2483_v62 = vpop.f32.mrb[36].mxu1 }
 0x136   : > { %2542 = vmatpush3.bf16.xpose.msk.msra.mxu1 %vm3124_vm2, %v2540_v32  ;;  %v1028_v2 = vadd.f32 %v2483_v62, %v3036_v53  ;;  %v1019_v58 = vpop.f32.mrb[37].mxu1 }
 0x137   : > { %2545 = vmatprep.subr.msk.bf16.mxu1 %vm3124_vm2, %v2543_v56  ;;  %v1020_v0 = vadd.f32 %v3036_v53, %v1019_v58  ;;  %v2484_v41 = vpop.f32.mrb[38].mxu1 }
 0x138   : > { %v1031_v13 = vadd.f32 %v2484_v41, %v3036_v53  ;;  %v1022_v3 = vpop.f32.mrb[39].mxu1 }
 0x139   : > { %v1023_v14 = vadd.f32 %v3036_v53, %v1022_v3 }
 0x13a   : > { %v2567_v33 = vpack.c.bf16 %v1031_v13, %v1028_v2 }
 0x13b   : > { %v2561_v10 = vpack.c.bf16 %v1023_v14, %v1020_v0  ;;  %2502 = vmatmul.mubr.msk.bf16.gmra.mrb[16].mxu0 %vm584_vm0, %v2958_v21  ;;  %v3724_v21 = vpack.c.bf16 %v3106_v9, %v3103_v7 }
 0x13c   : > { %2505 = vmatprep.mubr.msk.bf16.mxu0 %vm584_vm0, %v2961_v22  ;;  %v3725_v22 = vpack.c.bf16 %v3100_v4, %v3097_v1 }
 0x13e   : > { %2548 = vmatpush3.bf16.xpose.msk.msra.mxu1 %vm3124_vm2, %v2546_v39 }
 0x13f   : > { %2551 = vmatprep.subr.msk.bf16.mxu1 %vm3124_vm2, %v2549_v61  ;;  %v3390_v61 = vld [vmem:[%s3717_s8] ss:$0 sm:$0xff] }
 0x143   : > { %2506 = vmatmul.mubr.msk.bf16.gmra.mrb[20].mxu0 %vm584_vm0, %v2968_v23 }
 0x144   : > { %2509 = vmatprep.mubr.msk.bf16.mxu0 %vm584_vm0, %v2971_v24 }
 0x146   : > { %2554 = vmatpush3.bf16.xpose.msk.msra.mxu1 %vm3124_vm2, %v3722_v19 }
 0x147   : > { %2557 = vmatprep.subr.msk.bf16.mxu1 %vm3124_vm2, %v2555_v59 }
 0x14b   : > { %2510 = vmatmul.mubr.msk.bf16.gmra.mrb[24].mxu0 %vm584_vm0, %v2978_v25 }
 0x14c   : > { %2513 = vmatprep.mubr.msk.bf16.mxu0 %vm584_vm0, %v2981_v26 }
 0x14e   : > { %2560 = vmatpush3.bf16.xpose.msk.msra.mxu1 %vm3124_vm2, %v3723_v20 }
 0x14f   : > { %2563 = vmatprep.subr.msk.bf16.mxu1 %vm3124_vm2, %v2561_v10 }
 0x153   : > { %2514 = vmatmul.mubr.msk.bf16.gmra.mrb[28].mxu0 %vm584_vm0, %v2988_v27 }
 0x154   : > { %2517 = vmatprep.mubr.msk.bf16.mxu0 %vm584_vm0, %v2991_v28 }
 0x156   : > { %2566 = vmatpush3.bf16.xpose.msk.msra.mxu1 %vm3124_vm2, %v3724_v21 }
 0x157   : > { %2569 = vmatprep.subr.msk.bf16.mxu1 %vm3124_vm2, %v2567_v33 }
 0x15b   : > { %2518 = vmatmul.mubr.msk.bf16.gmra.mrb[32].mxu0 %vm584_vm0, %v2998_v29 }
 0x15c   : > { %2521 = vmatprep.mubr.msk.bf16.mxu0 %vm584_vm0, %v3001_v30 }
 0x15e   : > { %2572 = vmatpush3.bf16.xpose.msk.msra.mxu1 %vm3124_vm2, %v3725_v22 }
 0x163   : > { %2522 = vmatmul.mubr.msk.bf16.gmra.mrb[36].mxu0 %vm584_vm0, %v3008_v31 }
 0x165   : > { %2326 = vmatmul.mubr.msk.f32.vlgmr.msra.gmra.mrb[40].mxu1 %vm1234_vm1, %v3038_v54 }
 0x166   : > { %2327 = vmatprep.mubr.msk.f32.mxu1 %vm1234_vm1, %v3042_v60 }
 0x169   : > { %2328 = vmatmul.mubr.msk.f32.gmra.mrb[42].mxu1 %vm1234_vm1, %v3042_v60 }
 0x16a   : > { %2329 = vmatprep.mubr.msk.f32.mxu1 %vm1234_vm1, %v3031_v50 }
 0x16d   : > { %2330 = vmatmul.mubr.msk.f32.gmra.mrb[44].mxu1 %vm1234_vm1, %v3031_v50 }
 0x16e   : > { %2331 = vmatprep.mubr.msk.f32.mxu1 %vm1234_vm1, %v3040_v57 }
 0x171   : > { %2332 = vmatmul.mubr.msk.f32.gmra.mrb[46].mxu1 %vm1234_vm1, %v3040_v57 }
 0x172   : > { %2333 = vmatprep.mubr.msk.f32.mxu1 %vm1234_vm1, %v3058_v8 }
 0x175   : > { %2334 = vmatmul.mubr.msk.f32.gmra.mrb[48].mxu1 %vm1234_vm1, %v3058_v8 }
 0x176   : > { %2335 = vmatprep.mubr.msk.f32.mxu1 %vm1234_vm1, %v3062_v16 }
 0x179   : > { %2336 = vmatmul.mubr.msk.f32.gmra.mrb[50].mxu1 %vm1234_vm1, %v3062_v16 }
 0x17a   : > { %2337 = vmatprep.mubr.msk.f32.mxu1 %vm1234_vm1, %v3056_v5 }
 0x17d   : > { %2338 = vmatmul.mubr.msk.f32.gmra.mrb[52].mxu1 %vm1234_vm1, %v3056_v5 }
 0x17e   : > { %2339 = vmatprep.mubr.msk.f32.mxu1 %vm1234_vm1, %v3060_v11 }
 0x181   : > { %2340 = vmatmul.mubr.msk.f32.gmra.mrb[54].mxu1 %vm1234_vm1, %v3060_v11 }
 0x182   : > { %2341 = vmatprep.mubr.msk.f32.mxu1 %vm1234_vm1, %v3017_v36 }
 0x185   : > { %2342 = vmatmul.mubr.msk.f32.gmra.mrb[56].mxu1 %vm1234_vm1, %v3017_v36 }
 0x186   : > { %2343 = vmatprep.mubr.msk.f32.mxu1 %vm1234_vm1, %v3021_v40 }
 0x189   : > { %2344 = vmatmul.mubr.msk.f32.gmra.mrb[58].mxu1 %vm1234_vm1, %v3021_v40 }
 0x18a   : > { %2345 = vmatprep.mubr.msk.f32.mxu1 %vm1234_vm1, %v3015_v34 }
 0x18d   : > { %2346 = vmatmul.mubr.msk.f32.gmra.mrb[60].mxu1 %vm1234_vm1, %v3015_v34 }
 0x18e   : > { %2347 = vmatprep.mubr.msk.f32.mxu1 %vm1234_vm1, %v3019_v38 }
 0x191   : > { %2348 = vmatmul.mubr.msk.f32.gmra.mrb[62].mxu1 %vm1234_vm1, %v3019_v38 }
 0x192   : > { %2349 = vmatprep.mubr.msk.f32.mxu1 %vm1234_vm1, %v3025_v44 }
 0x195   : > { %2350 = vmatmul.mubr.msk.f32.gmra.mrb[64].mxu1 %vm1234_vm1, %v3025_v44 }
 0x196   : > { %2351 = vmatprep.mubr.msk.f32.mxu1 %vm1234_vm1, %v3029_v48 }
 0x199   : > { %2352 = vmatmul.mubr.msk.f32.gmra.mrb[66].mxu1 %vm1234_vm1, %v3029_v48 }
 0x19a   : > { %2353 = vmatprep.mubr.msk.f32.mxu1 %vm1234_vm1, %v3023_v42 }
 0x19d   : > { %2354 = vmatmul.mubr.msk.f32.gmra.mrb[68].mxu1 %vm1234_vm1, %v3023_v42 }
 0x19e   : > { %2355 = vmatprep.mubr.msk.f32.mxu1 %vm1234_vm1, %v3027_v46 }
 0x1a1   : > { %2356 = vmatmul.mubr.msk.f32.gmra.mrb[70].mxu1 %vm1234_vm1, %v3027_v46 }
 0x1fe   : > { %v2495_v59 = vpop.f32.mrb[8].mxu0 }
 0x1ff   : > { %v3393_v62 = vadd.f32 %v2495_v59, %v3390_v61  ;;  %v1107_v2 = vpop.f32.mrb[9].mxu0 }
 0x200   : > { %v1108_v58 = vadd.f32 %v3390_v61, %v1107_v2  ;;  %v2496_v0 = vpop.f32.mrb[10].mxu0 }
 0x201   : > { %v3397_v41 = vadd.f32 %v2496_v0, %v3390_v61  ;;  %v1110_v13 = vpop.f32.mrb[11].mxu0 }
 0x202   : > { %v1111_v3 = vadd.f32 %v3390_v61, %v1110_v13 }
 0x203   : > { %v1797_v33 = vpack.c.bf16 %v3397_v41, %v3393_v62 }
 0x204   : > { %v1796_v20 = vpack.c.bf16 %v1111_v3, %v1108_v58 }
 0x206   : > { %v2499_v14 = vpop.f32.mrb[12].mxu0 }
 0x207   : > { %v3403_v10 = vadd.f32 %v2499_v14, %v3390_v61  ;;  %v1123_v19 = vpop.f32.mrb[13].mxu0 }
 0x208   : > { %v3406_v21 = vadd.f32 %v3390_v61, %v1123_v19  ;;  %v2500_v22 = vpop.f32.mrb[14].mxu0 }
 0x238   : > { %v3291_v23 = vpop.f32.mrb[40].mxu1 }
 0x239   : > { %v3293_v24 = vpop.f32.mrb[41].mxu1 }
 0x23a   : > { %v1540_v25 = vmax.f32 %v3291_v23, %v3293_v24 }
 0x23c   : > { %1541 = vmax.xlane.f32.xlu0 %v1540_v25  ;;  %v3297_v26 = vpop.f32.mrb[42].mxu1  ;;  %v3409_v25 = vadd.f32 %v2500_v22, %v3390_v61 }
 0x23d   : > { %v3299_v27 = vpop.f32.mrb[43].mxu1 }
 0x23e   : > { %v1543_v28 = vmax.f32 %v3297_v26, %v3299_v27 }
 0x240   : > { %1544 = vmax.xlane.f32.xlu0 %v1543_v28  ;;  %v3303_v29 = vpop.f32.mrb[44].mxu1  ;;  %v1126_v28 = vpop.f32.mrb[15].mxu0 }
 0x241   : > { %v3305_v30 = vpop.f32.mrb[45].mxu1 }
 0x242   : > { %v1546_v31 = vmax.f32 %v3303_v29, %v3305_v30 }
 0x244   : > { %1547 = vmax.xlane.f32.xlu1 %v1546_v31  ;;  %v3309_v34 = vpop.f32.mrb[46].mxu1  ;;  %v3412_v31 = vadd.f32 %v3390_v61, %v1126_v28 }
 0x245   : > { %v3311_v36 = vpop.f32.mrb[47].mxu1 }
 0x246   : > { %v1549_v38 = vmax.f32 %v3309_v34, %v3311_v36 }
 0x248   : > { %1550 = vmax.xlane.f32.xlu1 %v1549_v38  ;;  %v3315_v40 = vpop.f32.mrb[48].mxu1  ;;  %v2503_v38 = vpop.f32.mrb[16].mxu0 }
 0x249   : > { %v3317_v42 = vpop.f32.mrb[49].mxu1 }
 0x24a   : > { %v1552_v44 = vmax.f32 %v3315_v40, %v3317_v42 }
 0x24c   : > { %1553 = vmax.xlane.f32.xlu0 %v1552_v44  ;;  %v3321_v46 = vpop.f32.mrb[50].mxu1  ;;  %v1799_v44 = vpack.c.bf16 %v3409_v25, %v3403_v10 }
 0x24d   : > { %v3323_v48 = vpop.f32.mrb[51].mxu1 }
 0x24e   : > { %v1555_v50 = vmax.f32 %v3321_v46, %v3323_v48 }
 0x250   : > { %1556 = vmax.xlane.f32.xlu1 %v1555_v50  ;;  %v3327_v53 = vpop.f32.mrb[52].mxu1  ;;  %v3417_v50 = vadd.f32 %v2503_v38, %v3390_v61 }
 0x251   : > { %v3329_v54 = vpop.f32.mrb[53].mxu1 }
 0x252   : > { %v1558_v57 = vmax.f32 %v3327_v53, %v3329_v54 }
 0x254   : > { %1559 = vmax.xlane.f32.xlu0 %v1558_v57  ;;  %v3333_v60 = vpop.f32.mrb[54].mxu1  ;;  %v1139_v57 = vpop.f32.mrb[17].mxu0 }
 0x255   : > { %v3335_v5 = vpop.f32.mrb[55].mxu1 }
 0x256   : > { %v1561_v8 = vmax.f32 %v3333_v60, %v3335_v5 }
 0x258   : > { %1562 = vmax.xlane.f32.xlu1 %v1561_v8  ;;  %v3339_v11 = vpop.f32.mrb[56].mxu1  ;;  %v1798_v8 = vpack.c.bf16 %v3412_v31, %v3406_v21 }
 0x259   : > { %v3341_v16 = vpop.f32.mrb[57].mxu1 }
 0x25a   : > { %v1564_v17 = vmax.f32 %v3339_v11, %v3341_v16 }
 0x25c   : > { %1565 = vmax.xlane.f32.xlu0 %v1564_v17  ;;  %v3345_v18 = vpop.f32.mrb[58].mxu1  ;;  %v3422_v17 = vadd.f32 %v3390_v61, %v1139_v57 }
 0x25d   : > { %v3347_v35 = vpop.f32.mrb[59].mxu1 }
 0x25e   : > { %v1567_v37 = vmax.f32 %v3345_v18, %v3347_v35 }
 0x260   : > { %1568 = vmax.xlane.f32.xlu1 %v1567_v37  ;;  %v3351_v39 = vpop.f32.mrb[60].mxu1  ;;  %v2504_v37 = vpop.f32.mrb[18].mxu0 }
 0x261   : > { %v3353_v32 = vpop.f32.mrb[61].mxu1 }
 0x262   : > { %v1570_v47 = vmax.f32 %v3351_v39, %v3353_v32 }
 0x264   : > { %1571 = vmax.xlane.f32.xlu0 %v1570_v47  ;;  %v3357_v49 = vpop.f32.mrb[62].mxu1  ;;  %v3425_v47 = vadd.f32 %v2504_v37, %v3390_v61 }
 0x265   : > { %v3359_v52 = vpop.f32.mrb[63].mxu1 }
 0x266   : > { %v1573_v55 = vmax.f32 %v3357_v49, %v3359_v52 }
 0x268   : > { %1574 = vmax.xlane.f32.xlu1 %v1573_v55  ;;  %v3363_v56 = vpop.f32.mrb[64].mxu1  ;;  %v1142_v55 = vpop.f32.mrb[19].mxu0 }
 0x269   : > { %v3365_v1 = vpop.f32.mrb[65].mxu1 }
 0x26a   : > { %v1576_v4 = vmax.f32 %v3363_v56, %v3365_v1 }
 0x26c   : > { %1577 = vmax.xlane.f32.xlu0 %v1576_v4  ;;  %v3369_v7 = vpop.f32.mrb[66].mxu1  ;;  %v1143_v4 = vadd.f32 %v3390_v61, %v1142_v55 }
 0x26d   : > { %v3371_v9 = vpop.f32.mrb[67].mxu1 }
 0x26e   : > { %v1579_v15 = vmax.f32 %v3369_v7, %v3371_v9  ;;  %v1800_v62 = vpack.c.bf16 %v1143_v4, %v3422_v17 }
 0x270   : > { %1580 = vmax.xlane.f32.xlu1 %v1579_v15  ;;  %v3375_v6 = vpop.f32.mrb[68].mxu1  ;;  %v2507_v15 = vpop.f32.mrb[20].mxu0 }
 0x271   : > { %v3377_v45 = vpop.f32.mrb[69].mxu1  ;;  %v1155_v59 = vpop.f32.mrb[21].mxu0 }
 0x272   : > { %v1582_v63 = vmax.f32 %v3375_v6, %v3377_v45  ;;  %v1156_v2 = vadd.f32 %v3390_v61, %v1155_v59  ;;  %v2508_v58 = vpop.f32.mrb[22].mxu0 }
 0x273   : > { %v1167_v0 = vadd.f32 %v2508_v58, %v3390_v61  ;;  %v1158_v41 = vpop.f32.mrb[23].mxu0 }
 0x274   : > { %1583 = vmax.xlane.f32.xlu0 %v1582_v63  ;;  %v3381_v12 = vpop.f32.mrb[70].mxu1  ;;  %v1801_v63 = vpack.c.bf16 %v3425_v47, %v3417_v50  ;;  %v1159_v13 = vadd.f32 %v3390_v61, %v1158_v41  ;;  %v2511_v3 = vpop.f32.mrb[24].mxu0 }
 0x275   : > { %v3383_v51 = vpop.f32.mrb[71].mxu1  ;;  %v1180_v19 = vadd.f32 %v2511_v3, %v3390_v61  ;;  %v1171_v21 = vpop.f32.mrb[25].mxu0 }
 0x276   : > { %v1585_v43 = vmax.f32 %v3381_v12, %v3383_v51  ;;  %v1802_v22 = vpack.c.bf16 %v1159_v13, %v1156_v2  ;;  %v1172_v28 = vadd.f32 %v3390_v61, %v1171_v21  ;;  %v2512_v31 = vpop.f32.mrb[26].mxu0 }
 0x277   : > { %v1183_v38 = vadd.f32 %v2512_v31, %v3390_v61  ;;  %v1174_v50 = vpop.f32.mrb[27].mxu0 }
 0x278   : > { %1586 = vmax.xlane.f32.xlu1 %v1585_v43  ;;  %v3431_v43 = vadd.f32 %v2507_v15, %v3390_v61  ;;  %v1175_v57 = vadd.f32 %v3390_v61, %v1174_v50  ;;  %v2515_v17 = vpop.f32.mrb[28].mxu0 }
 0x279   : > { %v1805_v37 = vpack.c.bf16 %v1183_v38, %v1180_v19  ;;  %v1196_v47 = vadd.f32 %v2515_v17, %v3390_v61  ;;  %v1187_v55 = vpop.f32.mrb[29].mxu0 }
 0x27a   : > { %v1803_v14 = vpack.c.bf16 %v1167_v0, %v3431_v43  ;;  %v1804_v4 = vpack.c.bf16 %v1175_v57, %v1172_v28  ;;  %v1188_v15 = vadd.f32 %v3390_v61, %v1187_v55  ;;  %v2516_v43 = vpop.f32.mrb[30].mxu0 }
 0x27b   : > { %v1199_v59 = vadd.f32 %v2516_v43, %v3390_v61  ;;  %v1190_v2 = vpop.f32.mrb[31].mxu0 }
 0x27c   : > { %2357 = vmatprep.subr.bf16.mxu0 %v1804_v4  ;;  %v1191_v58 = vadd.f32 %v3390_v61, %v1190_v2  ;;  %v2519_v0 = vpop.f32.mrb[32].mxu0 }
 0x27d   : > { %2358 = vmatpush3.bf16.msra.mxu0 %v1796_v20  ;;  %v1807_v41 = vpack.c.bf16 %v1199_v59, %v1196_v47  ;;  %v1212_v13 = vadd.f32 %v2519_v0, %v3390_v61  ;;  %v1203_v3 = vpop.f32.mrb[33].mxu0 }
 0x27e   : > { %v1806_v19 = vpack.c.bf16 %v1191_v58, %v1188_v15  ;;  %2359 = vmatprep.subr.bf16.mxu0 %v1805_v37  ;;  %v1204_v21 = vadd.f32 %v3390_v61, %v1203_v3  ;;  %v2520_v28 = vpop.f32.mrb[34].mxu0 }
 0x27f   : > { %v1215_v31 = vadd.f32 %v2520_v28, %v3390_v61  ;;  %v1206_v38 = vpop.f32.mrb[35].mxu0 }
 0x280   : > { %v1207_v50 = vadd.f32 %v3390_v61, %v1206_v38  ;;  %v2523_v57 = vpop.f32.mrb[36].mxu0 }
 0x281   : > { %2360 = vmatpush3.bf16.msra.mxu0 %v1797_v33  ;;  %v1809_v17 = vpack.c.bf16 %v1215_v31, %v1212_v13  ;;  %v1228_v55 = vadd.f32 %v2523_v57, %v3390_v61  ;;  %v1219_v20 = vpop.f32.mrb[37].mxu0 }
 0x282   : > { %2361 = vmatprep.subr.bf16.mxu0 %v1806_v19  ;;  %v1808_v47 = vpack.c.bf16 %v1207_v50, %v1204_v21  ;;  %v1220_v4 = vadd.f32 %v3390_v61, %v1219_v20  ;;  %v2524_v15 = vpop.f32.mrb[38].mxu0 }
 0x283   : > { %v1231_v37 = vadd.f32 %v2524_v15, %v3390_v61  ;;  %v1222_v43 = vpop.f32.mrb[39].mxu0 }
 0x284   : > { %v1223_v59 = vadd.f32 %v3390_v61, %v1222_v43 }
 0x285   : > { %2362 = vmatpush3.bf16.msra.mxu0 %v1798_v8  ;;  %v1811_v2 = vpack.c.bf16 %v1231_v37, %v1228_v55 }
 0x286   : > { %2363 = vmatprep.subr.bf16.mxu0 %v1807_v41  ;;  %v1810_v58 = vpack.c.bf16 %v1223_v59, %v1220_v4 }
 0x289   : > { %2364 = vmatpush3.bf16.msra.mxu0 %v1799_v44 }
 0x28a   : > { %2365 = vmatprep.subr.bf16.mxu0 %v1808_v47 }
 0x28d   : > { %2366 = vmatpush3.bf16.msra.mxu0 %v1800_v62 }
 0x28e   : > { %2367 = vmatprep.subr.bf16.mxu0 %v1809_v17 }
 0x291   : > { %2368 = vmatpush3.bf16.msra.mxu0 %v1801_v63 }
 0x292   : > { %2369 = vmatprep.subr.bf16.mxu0 %v1810_v58 }
 0x295   : > { %2370 = vmatpush3.bf16.msra.mxu0 %v1802_v22 }
 0x296   : > { %2371 = vmatprep.subr.bf16.mxu0 %v1811_v2 }
 0x299   : > { %2372 = vmatpush3.bf16.msra.mxu0 %v1803_v14 }
 0x2c9   : > { %v1542_v33 = vpop.xlane.xlu0 %1541 }
 0x2ca   : > { %v1588_v0 = vsub.f32 %v3291_v23, %v1542_v33  ;;  %v1589_v61 = vsub.f32 %v3293_v24, %v1542_v33 }
 0x2cc   : > { %v1620_v8 = vmul.f32 1.442695, %v1588_v0  ;;  %v1622_v41 = vmul.f32 1.442695, %v1589_v61 }
 0x2cd   : > { %v1545_v13 = vpop.xlane.xlu0 %1544 }
 0x2ce   : > { %2657 = vpow2.f32 %v1620_v8  ;;  %v1590_v10 = vsub.f32 %v3297_v26, %v1545_v13  ;;  %v1591_v25 = vsub.f32 %v3299_v27, %v1545_v13 }
 0x2cf   : > { %2659 = vpow2.f32 %v1622_v41 }
 0x2d0   : > { %v1624_v44 = vmul.f32 1.442695, %v1590_v10  ;;  %v1626_v63 = vmul.f32 1.442695, %v1591_v25 }
 0x2d1   : > { %v1548_v62 = vpop.xlane.xlu1 %1547 }
 0x2d2   : > { %2661 = vpow2.f32 %v1624_v44  ;;  %v1592_v14 = vsub.f32 %v3303_v29, %v1548_v62  ;;  %v1593_v22 = vsub.f32 %v3305_v30, %v1548_v62 }
 0x2d3   : > { %2663 = vpow2.f32 %v1626_v63 }
 0x2d4   : > { %v1628_v23 = vmul.f32 1.442695, %v1592_v14  ;;  %v1630_v24 = vmul.f32 1.442695, %v1593_v22 }
 0x2d5   : > { %v1551_v3 = vpop.xlane.xlu1 %1550 }
 0x2d6   : > { %2665 = vpow2.f32 %v1628_v23  ;;  %v1594_v19 = vsub.f32 %v3309_v34, %v1551_v3  ;;  %v1595_v26 = vsub.f32 %v3311_v36, %v1551_v3 }
 0x2d7   : > { %2667 = vpow2.f32 %v1630_v24 }
 0x2d8   : > { %v3465_v27 = vpop.eup %2657  ;;  %v1632_v21 = vmul.f32 1.442695, %v1594_v19  ;;  %v1634_v28 = vmul.f32 1.442695, %v1595_v26 }
 0x2d9   : > { %v3467_v31 = vpop.eup %2659  ;;  %v1554_v38 = vpop.xlane.xlu0 %1553 }
 0x2da   : > { %2669 = vpow2.f32 %v1632_v21  ;;  %v1596_v29 = vsub.f32 %v3315_v40, %v1554_v38  ;;  %v1597_v30 = vsub.f32 %v3317_v42, %v1554_v38  ;;  %v1684_v50 = vadd.f32 %v3467_v31, %v3465_v27 }
 0x2db   : > { %2671 = vpow2.f32 %v1634_v28 }
 0x2dc   : > { %v3473_v34 = vpop.eup %2661  ;;  %v1636_v36 = vmul.f32 1.442695, %v1596_v29  ;;  %v1638_v57 = vmul.f32 1.442695, %v1597_v30  ;;  %1685 = vadd.xlane.f32.xlu0 %v1684_v50 }
 0x2dd   : > { %v3475_v17 = vpop.eup %2663  ;;  %v1557_v55 = vpop.xlane.xlu1 %1556 }
 0x2de   : > { %2673 = vpow2.f32 %v1636_v36  ;;  %v1598_v20 = vsub.f32 %v3321_v46, %v1557_v55  ;;  %v1599_v47 = vsub.f32 %v3323_v48, %v1557_v55  ;;  %v1687_v40 = vadd.f32 %v3475_v17, %v3473_v34 }
 0x2df   : > { %2675 = vpow2.f32 %v1638_v57 }
 0x2e0   : > { %v3481_v42 = vpop.eup %2665  ;;  %v1640_v4 = vmul.f32 1.442695, %v1598_v20  ;;  %v1642_v15 = vmul.f32 1.442695, %v1599_v47  ;;  %1688 = vadd.xlane.f32.xlu1 %v1687_v40 }
 0x2e1   : > { %v3483_v37 = vpop.eup %2667  ;;  %v1560_v43 = vpop.xlane.xlu0 %1559 }
 0x2e2   : > { %2677 = vpow2.f32 %v1640_v4  ;;  %v1600_v59 = vsub.f32 %v3327_v53, %v1560_v43  ;;  %v1601_v2 = vsub.f32 %v3329_v54, %v1560_v43  ;;  %v1690_v46 = vadd.f32 %v3483_v37, %v3481_v42 }
 0x2e3   : > { %2679 = vpow2.f32 %v1642_v15 }
 0x2e4   : > { %v3489_v48 = vpop.eup %2669  ;;  %v1644_v58 = vmul.f32 1.442695, %v1600_v59  ;;  %v1646_v33 = vmul.f32 1.442695, %v1601_v2  ;;  %1691 = vadd.xlane.f32.xlu0 %v1690_v46 }
 0x2e5   : > { %v3491_v0 = vpop.eup %2671  ;;  %v1563_v61 = vpop.xlane.xlu1 %1562 }
 0x2e6   : > { %2681 = vpow2.f32 %v1644_v58  ;;  %v1602_v8 = vsub.f32 %v3333_v60, %v1563_v61  ;;  %v1603_v41 = vsub.f32 %v3335_v5, %v1563_v61  ;;  %v1693_v53 = vadd.f32 %v3491_v0, %v3489_v48 }
 0x2e7   : > { %2683 = vpow2.f32 %v1646_v33 }
 0x2e8   : > { %v3497_v54 = vpop.eup %2673  ;;  %v1648_v13 = vmul.f32 1.442695, %v1602_v8  ;;  %v1650_v10 = vmul.f32 1.442695, %v1603_v41  ;;  %1694 = vadd.xlane.f32.xlu1 %v1693_v53 }
 0x2e9   : > { %v3499_v25 = vpop.eup %2675  ;;  %v1566_v44 = vpop.xlane.xlu0 %1565 }
 0x2ea   : > { %2685 = vpow2.f32 %v1648_v13  ;;  %v1604_v63 = vsub.f32 %v3339_v11, %v1566_v44  ;;  %v1605_v62 = vsub.f32 %v3341_v16, %v1566_v44  ;;  %v1696_v60 = vadd.f32 %v3499_v25, %v3497_v54 }
 0x2eb   : > { %2687 = vpow2.f32 %v1650_v10 }
 0x2ec   : > { %v3505_v5 = vpop.eup %2677  ;;  %v1652_v14 = vmul.f32 1.442695, %v1604_v63  ;;  %v1654_v22 = vmul.f32 1.442695, %v1605_v62  ;;  %1697 = vadd.xlane.f32.xlu0 %v1696_v60 }
 0x2ed   : > { %v3507_v23 = vpop.eup %2679  ;;  %v1569_v24 = vpop.xlane.xlu1 %1568 }
 0x2ee   : > { %2689 = vpow2.f32 %v1652_v14  ;;  %v1606_v3 = vsub.f32 %v3345_v18, %v1569_v24  ;;  %v1607_v19 = vsub.f32 %v3347_v35, %v1569_v24  ;;  %v1699_v11 = vadd.f32 %v3507_v23, %v3505_v5 }
 0x2ef   : > { %2691 = vpow2.f32 %v1654_v22 }
 0x2f0   : > { %v3513_v16 = vpop.eup %2681  ;;  %v1656_v26 = vmul.f32 1.442695, %v1606_v3  ;;  %v1658_v21 = vmul.f32 1.442695, %v1607_v19  ;;  %1700 = vadd.xlane.f32.xlu1 %v1699_v11 }
 0x2f1   : > { %v3515_v28 = vpop.eup %2683  ;;  %v1572_v38 = vpop.xlane.xlu0 %1571 }
 0x2f2   : > { %2693 = vpow2.f32 %v1656_v26  ;;  %v1608_v29 = vsub.f32 %v3351_v39, %v1572_v38  ;;  %v1609_v30 = vsub.f32 %v3353_v32, %v1572_v38  ;;  %v1702_v18 = vadd.f32 %v3515_v28, %v3513_v16 }
 0x2f3   : > { %2695 = vpow2.f32 %v1658_v21 }
 0x2f4   : > { %v3521_v35 = vpop.eup %2685  ;;  %v1660_v50 = vmul.f32 1.442695, %v1608_v29  ;;  %v1662_v36 = vmul.f32 1.442695, %v1609_v30  ;;  %1703 = vadd.xlane.f32.xlu0 %v1702_v18 }
 0x2f5   : > { %v3523_v57 = vpop.eup %2687  ;;  %v1575_v55 = vpop.xlane.xlu1 %1574 }
 0x2f6   : > { %2697 = vpow2.f32 %v1660_v50  ;;  %v1610_v20 = vsub.f32 %v3357_v49, %v1575_v55  ;;  %v1611_v47 = vsub.f32 %v3359_v52, %v1575_v55  ;;  %v1705_v39 = vadd.f32 %v3523_v57, %v3521_v35 }
 0x2f7   : > { %2699 = vpow2.f32 %v1662_v36 }
 0x2f8   : > { %v3529_v32 = vpop.eup %2689  ;;  %v1664_v40 = vmul.f32 1.442695, %v1610_v20  ;;  %v1666_v4 = vmul.f32 1.442695, %v1611_v47  ;;  %1706 = vadd.xlane.f32.xlu1 %v1705_v39 }
 0x2f9   : > { %v3531_v15 = vpop.eup %2691  ;;  %v1578_v43 = vpop.xlane.xlu0 %1577 }
 0x2fa   : > { %2701 = vpow2.f32 %v1664_v40  ;;  %v1612_v59 = vsub.f32 %v3363_v56, %v1578_v43  ;;  %v1613_v2 = vsub.f32 %v3365_v1, %v1578_v43  ;;  %v1708_v49 = vadd.f32 %v3531_v15, %v3529_v32 }
 0x2fb   : > { %2703 = vpow2.f32 %v1666_v4 }
 0x2fc   : > { %v3537_v52 = vpop.eup %2693  ;;  %v1668_v46 = vmul.f32 1.442695, %v1612_v59  ;;  %v1670_v58 = vmul.f32 1.442695, %v1613_v2  ;;  %1709 = vadd.xlane.f32.xlu0 %v1708_v49 }
 0x2fd   : > { %v3539_v33 = vpop.eup %2695  ;;  %v1581_v61 = vpop.xlane.xlu1 %1580 }
 0x2fe   : > { %2705 = vpow2.f32 %v1668_v46  ;;  %v1614_v8 = vsub.f32 %v3369_v7, %v1581_v61  ;;  %v1615_v41 = vsub.f32 %v3371_v9, %v1581_v61  ;;  %v1711_v56 = vadd.f32 %v3539_v33, %v3537_v52 }
 0x2ff   : > { %2707 = vpow2.f32 %v1670_v58 }
 0x300   : > { %v3545_v1 = vpop.eup %2697  ;;  %v1672_v53 = vmul.f32 1.442695, %v1614_v8  ;;  %v1674_v13 = vmul.f32 1.442695, %v1615_v41  ;;  %1712 = vadd.xlane.f32.xlu1 %v1711_v56 }
 0x301   : > { %v3547_v10 = vpop.eup %2699  ;;  %v1584_v44 = vpop.xlane.xlu0 %1583 }
 0x302   : > { %2709 = vpow2.f32 %v1672_v53  ;;  %v1616_v63 = vsub.f32 %v3375_v6, %v1584_v44  ;;  %v1617_v62 = vsub.f32 %v3377_v45, %v1584_v44  ;;  %v1714_v7 = vadd.f32 %v3547_v10, %v3545_v1 }
 0x303   : > { %2711 = vpow2.f32 %v1674_v13 }
 0x304   : > { %v3553_v9 = vpop.eup %2701  ;;  %v1676_v60 = vmul.f32 1.442695, %v1616_v63  ;;  %v1678_v14 = vmul.f32 1.442695, %v1617_v62  ;;  %1715 = vadd.xlane.f32.xlu0 %v1714_v7 }
 0x305   : > { %v3555_v22 = vpop.eup %2703  ;;  %v1587_v24 = vpop.xlane.xlu1 %1586 }
 0x306   : > { %2713 = vpow2.f32 %v1676_v60  ;;  %v1618_v3 = vsub.f32 %v3381_v12, %v1587_v24  ;;  %v1619_v19 = vsub.f32 %v3383_v51, %v1587_v24  ;;  %v1717_v6 = vadd.f32 %v3555_v22, %v3553_v9 }
 0x307   : > { %2715 = vpow2.f32 %v1678_v14 }
 0x308   : > { %v3561_v45 = vpop.eup %2705  ;;  %v1680_v11 = vmul.f32 1.442695, %v1618_v3  ;;  %v1682_v26 = vmul.f32 1.442695, %v1619_v19  ;;  %1718 = vadd.xlane.f32.xlu1 %v1717_v6 }
 0x309   : > { %v3563_v21 = vpop.eup %2707 }
 0x30a   : > { %2717 = vpow2.f32 %v1680_v11  ;;  %v1720_v38 = vadd.f32 %v3563_v21, %v3561_v45 }
 0x30b   : > { %2719 = vpow2.f32 %v1682_v26 }
 0x30c   : > { %v3567_v29 = vpop.eup %2709  ;;  %1721 = vadd.xlane.f32.xlu0 %v1720_v38 }
 0x30d   : > { %v3569_v12 = vpop.eup %2711 }
 0x30e   : > { %v1723_v51 = vadd.f32 %v3569_v12, %v3567_v29 }
 0x310   : > { %v3573_v30 = vpop.eup %2713  ;;  %1724 = vadd.xlane.f32.xlu1 %v1723_v51 }
 0x311   : > { %v3575_v18 = vpop.eup %2715 }
 0x312   : > { %v1726_v50 = vadd.f32 %v3575_v18, %v3573_v30 }
 0x314   : > { %v3579_v36 = vpop.eup %2717  ;;  %1727 = vadd.xlane.f32.xlu0 %v1726_v50 }
 0x315   : > { %v3581_v55 = vpop.eup %2719 }
 0x316   : > { %v1729_v20 = vadd.f32 %v3581_v55, %v3579_v36 }
 0x318   : > { %1730 = vadd.xlane.f32.xlu1 %v1729_v20 }
 0x369   : > { %v1686_v47 = vpop.xlane.xlu0 %1685 }
 0x36a   : > { %2721 = vrcp.f32 %v1686_v47 }
 0x36d   : > { %v1689_v39 = vpop.xlane.xlu1 %1688 }
 0x36e   : > { %2723 = vrcp.f32 %v1689_v39 }
 0x371   : > { %v1692_v40 = vpop.xlane.xlu0 %1691 }
 0x372   : > { %2725 = vrcp.f32 %v1692_v40 }
 0x374   : > { %v2722_v43 = vpop.eup %2721 }
 0x375   : > { %v1695_v4 = vpop.xlane.xlu1 %1694  ;;  %v1748_v2 = vmul.f32 %v2722_v43, %v3465_v27  ;;  %v1749_v58 = vmul.f32 %v2722_v43, %v3467_v31 }
 0x376   : > { %2727 = vrcp.f32 %v1695_v4 }
 0x378   : > { %v2724_v59 = vpop.eup %2723 }
 0x379   : > { %v1750_v49 = vmul.f32 %v2724_v59, %v3473_v34  ;;  %v1698_v46 = vpop.xlane.xlu0 %1697  ;;  %v1751_v61 = vmul.f32 %v2724_v59, %v3475_v17 }
 0x37a   : > { %2729 = vrcp.f32 %v1698_v46 }
 0x37b   : > { %v1781_v8 = vpack.c.bf16 %v1751_v61, %v1749_v58  ;;  %v1780_v41 = vpack.c.bf16 %v1750_v49, %v1748_v2 }
 0x37c   : > { %v2726_v53 = vpop.eup %2725 }
 0x37d   : > { %1844 = vmatprep.mubr.bf16.mxu0 %v1781_v8  ;;  %v1701_v56 = vpop.xlane.xlu1 %1700  ;;  %v1753_v63 = vmul.f32 %v2726_v53, %v3483_v37  ;;  %v1752_v34 = vmul.f32 %v2726_v53, %v3481_v42 }
 0x37e   : > { %2731 = vrcp.f32 %v1701_v56  ;;  %1845 = vmatmul.mubr.bf16.vlgmr.msra.gmra.mrb[40].mxu0 %v1780_v41 }
 0x380   : > { %v2728_v13 = vpop.eup %2727 }
 0x381   : > { %v1704_v44 = vpop.xlane.xlu0 %1703  ;;  %v1755_v27 = vmul.f32 %v2728_v13, %v3491_v0  ;;  %v1754_v31 = vmul.f32 %v2728_v13, %v3489_v48 }
 0x382   : > { %2733 = vrcp.f32 %v1704_v44 }
 0x383   : > { %v1783_v62 = vpack.c.bf16 %v1755_v27, %v1753_v63  ;;  %v1782_v17 = vpack.c.bf16 %v1754_v31, %v1752_v34 }
 0x384   : > { %v2730_v60 = vpop.eup %2729 }
 0x385   : > { %1852 = vmatprep.mubr.bf16.mxu0 %v1783_v62  ;;  %v1707_v7 = vpop.xlane.xlu1 %1706  ;;  %v1757_v3 = vmul.f32 %v2730_v60, %v3499_v25  ;;  %v1756_v0 = vmul.f32 %v2730_v60, %v3497_v54 }
 0x386   : > { %2735 = vrcp.f32 %v1707_v7  ;;  %1853 = vmatmul.mubr.bf16.gmra.mrb[44].mxu0 %v1782_v17 }
 0x388   : > { %v2732_v14 = vpop.eup %2731 }
 0x389   : > { %v1710_v24 = vpop.xlane.xlu0 %1709  ;;  %v1759_v37 = vmul.f32 %v2732_v14, %v3507_v23  ;;  %v1758_v42 = vmul.f32 %v2732_v14, %v3505_v5  ;;  %v1928_v14 = vld [vmem:[%s3621_s21 + $0x8] sm:$0xff] }
 0x38a   : > { %2737 = vrcp.f32 %v1710_v24 }
 0x38b   : > { %v1785_v19 = vpack.c.bf16 %v1759_v37, %v1757_v3  ;;  %v1784_v48 = vpack.c.bf16 %v1758_v42, %v1756_v0 }
 0x38c   : > { %v2734_v11 = vpop.eup %2733 }
 0x38d   : > { %1860 = vmatprep.mubr.bf16.mxu0 %v1785_v19  ;;  %v1713_v6 = vpop.xlane.xlu1 %1712  ;;  %v1761_v51 = vmul.f32 %v2734_v11, %v3515_v28  ;;  %v1760_v23 = vmul.f32 %v2734_v11, %v3513_v16 }
 0x38e   : > { %2739 = vrcp.f32 %v1713_v6  ;;  %1861 = vmatmul.mubr.bf16.gmra.mrb[48].mxu0 %v1784_v48  ;;  %v1929_v6 = vld [vmem:[%s3621_s21 + $0x10] sm:$0xff] }
 0x390   : > { %v2736_v26 = vpop.eup %2735 }
 0x391   : > { %v1716_v38 = vpop.xlane.xlu0 %1715  ;;  %v1763_v25 = vmul.f32 %v2736_v26, %v3523_v57  ;;  %v1762_v54 = vmul.f32 %v2736_v26, %v3521_v35 }
 0x392   : > { %2741 = vrcp.f32 %v1716_v38 }
 0x393   : > { %v1787_v50 = vpack.c.bf16 %v1763_v25, %v1761_v51  ;;  %v1786_v5 = vpack.c.bf16 %v1762_v54, %v1760_v23  ;;  %v1930_v51 = vld [vmem:[%s3621_s21 + $0x18] sm:$0xff] }
 0x394   : > { %v2738_v47 = vpop.eup %2737 }
 0x395   : > { %1868 = vmatprep.mubr.bf16.mxu0 %v1787_v50  ;;  %v1719_v20 = vpop.xlane.xlu1 %1718  ;;  %v1765_v4 = vmul.f32 %v2738_v47, %v3531_v15  ;;  %v1764_v57 = vmul.f32 %v2738_v47, %v3529_v32 }
 0x396   : > { %2743 = vrcp.f32 %v1719_v20  ;;  %1869 = vmatmul.mubr.bf16.gmra.mrb[52].mxu0 %v1786_v5 }
 0x398   : > { %v2740_v39 = vpop.eup %2739 }
 0x399   : > { %v1722_v40 = vpop.xlane.xlu0 %1721  ;;  %v1767_v28 = vmul.f32 %v2740_v39, %v3539_v33  ;;  %v1766_v16 = vmul.f32 %v2740_v39, %v3537_v52  ;;  %v1931_v39 = vld [vmem:[%s3621_s21 + $0x20] sm:$0xff] }
 0x39a   : > { %2745 = vrcp.f32 %v1722_v40 }
 0x39b   : > { %v1789_v43 = vpack.c.bf16 %v1767_v28, %v1765_v4  ;;  %v1788_v35 = vpack.c.bf16 %v1766_v16, %v1764_v57  ;;  %v1932_v57 = vld [vmem:[%s3621_s21 + $0x28] sm:$0xff] }
 0x39c   : > { %v2742_v2 = vpop.eup %2741 }
 0x39d   : > { %1876 = vmatprep.mubr.bf16.mxu0 %v1789_v43  ;;  %v1725_v59 = vpop.xlane.xlu1 %1724  ;;  %v1769_v58 = vmul.f32 %v2742_v2, %v3547_v10  ;;  %v1768_v33 = vmul.f32 %v2742_v2, %v3545_v1 }
 0x39e   : > { %2747 = vrcp.f32 %v1725_v59  ;;  %1877 = vmatmul.mubr.bf16.gmra.mrb[56].mxu0 %v1788_v35 }
 0x3a0   : > { %v2744_v49 = vpop.eup %2743 }
 0x3a1   : > { %v1728_v46 = vpop.xlane.xlu0 %1727  ;;  %v1771_v15 = vmul.f32 %v2744_v49, %v3555_v22  ;;  %v1770_v32 = vmul.f32 %v2744_v49, %v3553_v9 }
 0x3a2   : > { %2749 = vrcp.f32 %v1728_v46 }
 0x3a3   : > { %v1791_v61 = vpack.c.bf16 %v1771_v15, %v1769_v58  ;;  %v1790_v52 = vpack.c.bf16 %v1770_v32, %v1768_v33  ;;  %v1933_v58 = vld [vmem:[%s3621_s21 + $0x30] sm:$0xff] }
 0x3a4   : > { %v2746_v41 = vpop.eup %2745 }
 0x3a5   : > { %1884 = vmatprep.mubr.bf16.mxu0 %v1791_v61  ;;  %v1731_v8 = vpop.xlane.xlu1 %1730  ;;  %v1773_v53 = vmul.f32 %v2746_v41, %v3563_v21  ;;  %v1772_v10 = vmul.f32 %v2746_v41, %v3561_v45  ;;  %v1934_v61 = vld [vmem:[%s3621_s21 + $0x38] sm:$0xff] }
 0x3a6   : > { %2751 = vrcp.f32 %v1731_v8  ;;  %1885 = vmatmul.mubr.bf16.gmra.mrb[60].mxu0 %v1790_v52 }
 0x3a8   : > { %v2748_v56 = vpop.eup %2747 }
 0x3a9   : > { %v1775_v13 = vmul.f32 %v2748_v56, %v3569_v12  ;;  %v1774_v22 = vmul.f32 %v2748_v56, %v3567_v29 }
 0x3ab   : > { %v1793_v1 = vpack.c.bf16 %v1775_v13, %v1773_v53  ;;  %v1792_v9 = vpack.c.bf16 %v1774_v22, %v1772_v10  ;;  %v1935_v22 = vld [vmem:[%s3621_s21 + $0x40] sm:$0xff] }
 0x3ac   : > { %v2750_v44 = vpop.eup %2749 }
 0x3ad   : > { %1892 = vmatprep.mubr.bf16.mxu0 %v1793_v1  ;;  %v1777_v27 = vmul.f32 %v2750_v44, %v3575_v18  ;;  %v1776_v31 = vmul.f32 %v2750_v44, %v3573_v30  ;;  %v3623_v18 = vstv %s1909_s12 }
 0x3ae   : > { %1893 = vmatmul.mubr.bf16.gmra.mrb[64].mxu0 %v1792_v9 }
 0x3b0   : > { %v2752_v63 = vpop.eup %2751 }
 0x3b1   : > { %v1779_v34 = vmul.f32 %v2752_v63, %v3581_v55  ;;  %v1778_v21 = vmul.f32 %v2752_v63, %v3579_v36  ;;  %v1927_v36 = vld [vmem:[%s3621_s21] sm:$0xff]  ;;  %v1936_v63 = vld [vmem:[%s3621_s21 + $0x48] sm:$0xff] }
 0x3b3   : > { %v1795_v12 = vpack.c.bf16 %v1779_v34, %v1777_v27  ;;  %v1794_v62 = vpack.c.bf16 %v1778_v21, %v1776_v31 }
 0x3b5   : > { %1900 = vmatprep.mubr.bf16.mxu0 %v1795_v12 }
 0x3b6   : > { %1901 = vmatmul.mubr.bf16.gmra.mrb[68].mxu0 %v1794_v62 }
 0x451   : > { %v2373_v45 = vpop.f32.mrb[40].mxu0 }
 0x452   : > { %v2374_v29 = vpop.f32.mrb[41].mxu0 }
 0x453   : > { %v2375_v30 = vadd.f32 %v2374_v29, %v2373_v45  ;;  %v2376_v55 = vpop.f32.mrb[42].mxu0  ;;  %v1937_v29 = vld [vmem:[%s3621_s21 + $0x50] sm:$0xff] }
 0x454   : > { %v2377_v17 = vpop.f32.mrb[43].mxu0 }
 0x455   : > { %v1911_v7 = vmul.f32 %v2375_v30, %v3623_v18  ;;  %v2378_v60 = vadd.f32 %v2377_v17, %v2376_v55  ;;  %v1938_v17 = vld [vmem:[%s3621_s21 + $0x58] sm:$0xff] }
 0x457   : > { %v1943_v24 = vadd.f32 %v1927_v36, %v1911_v7  ;;  %v1912_v3 = vmul.f32 %v2378_v60, %v3623_v18 }
 0x459   : > { %1959 = vst.msk [vmem:[%s3630_s24] sm:$0xff] %vm584_vm0, %v1943_v24  ;;  %v1944_v37 = vadd.f32 %v1928_v14, %v1912_v3  ;;  %v2379_v0 = vpop.f32.mrb[44].mxu0 }
 0x45a   : > { %v2380_v42 = vpop.f32.mrb[45].mxu0 }
 0x45b   : > { %1960 = vst.msk [vmem:[%s3630_s24 + $0x8] sm:$0xff] %vm584_vm0, %v1944_v37  ;;  %v2381_v19 = vadd.f32 %v2380_v42, %v2379_v0  ;;  %v2382_v48 = vpop.f32.mrb[46].mxu0  ;;  %v1939_v42 = vld [vmem:[%s3621_s21 + $0x60] sm:$0xff] }
 0x45c   : > { %v2383_v11 = vpop.f32.mrb[47].mxu0 }
 0x45d   : > { %v1913_v26 = vmul.f32 %v2381_v19, %v3623_v18  ;;  %v2384_v38 = vadd.f32 %v2383_v11, %v2382_v48  ;;  %v1940_v11 = vld [vmem:[%s3621_s21 + $0x68] sm:$0xff] }
 0x45f   : > { %v1945_v25 = vadd.f32 %v1929_v6, %v1913_v26  ;;  %v1914_v23 = vmul.f32 %v2384_v38, %v3623_v18 }
 0x461   : > { %1961 = vst.msk [vmem:[%s3630_s24 + $0x10] sm:$0xff] %vm584_vm0, %v1945_v25  ;;  %v1946_v54 = vadd.f32 %v1930_v51, %v1914_v23  ;;  %v2385_v50 = vpop.f32.mrb[48].mxu0 }
 0x462   : > { %v2386_v5 = vpop.f32.mrb[49].mxu0 }
 0x463   : > { %1962 = vst.msk [vmem:[%s3630_s24 + $0x18] sm:$0xff] %vm584_vm0, %v1946_v54  ;;  %v2387_v20 = vadd.f32 %v2386_v5, %v2385_v50  ;;  %v2388_v47 = vpop.f32.mrb[50].mxu0  ;;  %v1941_v5 = vld [vmem:[%s3621_s21 + $0x70] sm:$0xff] }
 0x464   : > { %v2389_v40 = vpop.f32.mrb[51].mxu0 }
 0x465   : > { %v1915_v4 = vmul.f32 %v2387_v20, %v3623_v18  ;;  %v2390_v28 = vadd.f32 %v2389_v40, %v2388_v47  ;;  %v1942_v40 = vld [vmem:[%s3621_s21 + $0x78] sm:$0xff] }
 0x467   : > { %v1947_v16 = vadd.f32 %v1931_v39, %v1915_v4  ;;  %v1916_v43 = vmul.f32 %v2390_v28, %v3623_v18 }
 0x469   : > { %1963 = vst.msk [vmem:[%s3630_s24 + $0x20] sm:$0xff] %vm584_vm0, %v1947_v16  ;;  %v1948_v35 = vadd.f32 %v1932_v57, %v1916_v43  ;;  %v2391_v59 = vpop.f32.mrb[52].mxu0 }
 0x46a   : > { %v2392_v2 = vpop.f32.mrb[53].mxu0 }
 0x46b   : > { %1964 = vst.msk [vmem:[%s3630_s24 + $0x28] sm:$0xff] %vm584_vm0, %v1948_v35  ;;  %v2393_v49 = vadd.f32 %v2392_v2, %v2391_v59  ;;  %v2394_v46 = vpop.f32.mrb[54].mxu0 }
 0x46c   : > { %v2395_v15 = vpop.f32.mrb[55].mxu0 }
 0x46d   : > { %v1917_v33 = vmul.f32 %v2393_v49, %v3623_v18  ;;  %v2396_v32 = vadd.f32 %v2395_v15, %v2394_v46 }
 0x46f   : > { %v1949_v52 = vadd.f32 %v1933_v58, %v1917_v33  ;;  %v1918_v8 = vmul.f32 %v2396_v32, %v3623_v18 }
 0x471   : > { %1965 = vst.msk [vmem:[%s3630_s24 + $0x30] sm:$0xff] %vm584_vm0, %v1949_v52  ;;  %v1950_v41 = vadd.f32 %v1934_v61, %v1918_v8  ;;  %v2397_v56 = vpop.f32.mrb[56].mxu0 }
 0x472   : > { %v2398_v53 = vpop.f32.mrb[57].mxu0 }
 0x473   : > { %1966 = vst.msk [vmem:[%s3630_s24 + $0x38] sm:$0xff] %vm584_vm0, %v1950_v41  ;;  %v2399_v13 = vadd.f32 %v2398_v53, %v2397_v56  ;;  %v2400_v10 = vpop.f32.mrb[58].mxu0 }
 0x474   : > { %v2401_v1 = vpop.f32.mrb[59].mxu0 }
 0x475   : > { %v1919_v9 = vmul.f32 %v2399_v13, %v3623_v18  ;;  %v2402_v44 = vadd.f32 %v2401_v1, %v2400_v10 }
 0x477   : > { %v1951_v27 = vadd.f32 %v1935_v22, %v1919_v9  ;;  %v1920_v34 = vmul.f32 %v2402_v44, %v3623_v18 }
 0x479   : > { %1967 = vst.msk [vmem:[%s3630_s24 + $0x40] sm:$0xff] %vm584_vm0, %v1951_v27  ;;  %v1952_v31 = vadd.f32 %v1936_v63, %v1920_v34  ;;  %v2403_v21 = vpop.f32.mrb[60].mxu0 }
 0x47a   : > { %v2404_v12 = vpop.f32.mrb[61].mxu0 }
 0x47b   : > { %1968 = vst.msk [vmem:[%s3630_s24 + $0x48] sm:$0xff] %vm584_vm0, %v1952_v31  ;;  %v2405_v62 = vadd.f32 %v2404_v12, %v2403_v21  ;;  %v2406_v45 = vpop.f32.mrb[62].mxu0 }
 0x47c   : > { %v2407_v30 = vpop.f32.mrb[63].mxu0 }
 0x47d   : > { %v1921_v55 = vmul.f32 %v2405_v62, %v3623_v18  ;;  %v2408_v36 = vadd.f32 %v2407_v30, %v2406_v45 }
 0x47f   : > { %v1953_v7 = vadd.f32 %v1937_v29, %v1921_v55  ;;  %v1922_v60 = vmul.f32 %v2408_v36, %v3623_v18 }
 0x481   : > { %1969 = vst.msk [vmem:[%s3630_s24 + $0x50] sm:$0xff] %vm584_vm0, %v1953_v7  ;;  %v1954_v14 = vadd.f32 %v1938_v17, %v1922_v60  ;;  %v2409_v24 = vpop.f32.mrb[64].mxu0 }
 0x482   : > { %v2410_v3 = vpop.f32.mrb[65].mxu0 }
 0x483   : > { %1970 = vst.msk [vmem:[%s3630_s24 + $0x58] sm:$0xff] %vm584_vm0, %v1954_v14  ;;  %v2411_v37 = vadd.f32 %v2410_v3, %v2409_v24  ;;  %v2412_v0 = vpop.f32.mrb[66].mxu0 }
 0x484   : > { %v2413_v19 = vpop.f32.mrb[67].mxu0 }
 0x485   : > { %v1923_v48 = vmul.f32 %v2411_v37, %v3623_v18  ;;  %v2414_v6 = vadd.f32 %v2413_v19, %v2412_v0 }
 0x487   : > { %v1955_v26 = vadd.f32 %v1939_v42, %v1923_v48  ;;  %v1924_v38 = vmul.f32 %v2414_v6, %v3623_v18 }
 0x489   : > { %1971 = vst.msk [vmem:[%s3630_s24 + $0x60] sm:$0xff] %vm584_vm0, %v1955_v26  ;;  %v1956_v51 = vadd.f32 %v1940_v11, %v1924_v38  ;;  %v2415_v25 = vpop.f32.mrb[68].mxu0 }
 0x48a   : > { %v2416_v23 = vpop.f32.mrb[69].mxu0 }
 0x48b   : > { %1972 = vst.msk [vmem:[%s3630_s24 + $0x68] sm:$0xff] %vm584_vm0, %v1956_v51  ;;  %v2417_v54 = vadd.f32 %v2416_v23, %v2415_v25  ;;  %v2418_v50 = vpop.f32.mrb[70].mxu0 }
 0x48c   : > { %v2419_v20 = vpop.f32.mrb[71].mxu0 }
 0x48d   : > { %v1925_v47 = vmul.f32 %v2417_v54, %v3623_v18  ;;  %v2420_v39 = vadd.f32 %v2419_v20, %v2418_v50 }
 0x48f   : > { %v1957_v4 = vadd.f32 %v1941_v5, %v1925_v47  ;;  %v1926_v28 = vmul.f32 %v2420_v39, %v3623_v18 }
 0x491   : > { %1973 = vst.msk [vmem:[%s3630_s24 + $0x70] sm:$0xff] %vm584_vm0, %v1957_v4  ;;  %v1958_v57 = vadd.f32 %v1942_v40, %v1926_v28 }
 0x493   : > { %1974 = vst.msk [vmem:[%s3630_s24 + $0x78] sm:$0xff] %vm584_vm0, %v1958_v57 }
 0x494 PF: > { %s21_s19 = sadd.s32 1, %s2791_s19   ;;  %s3726_s15 = smov %s2783_s17 }
 0x495   : > { %p18_p7 = scmp.ge.s32.totalorder %s21_s19, 6   ;;  %s3727_s16 = smov %s2787_s18 }
 0x496   : > { %s3728_s17 = smov %s3731_s9  ;;  %s3729_s18 = smov %s3735_s20 }
 0x497   :  { %20 = sbr.rel (!%p18_p7) target bundleno = 3 (0x3), region = 96 }

</bundles_post_ra>
